<compile_context>
chip_gen: v6e
topology: v6e:2x2x1
jax: 0.10.0
libtpu: 0.0.40
codegen_flags: <defaults>
</compile_context>

<pallas_src>
import math

import jax
import jax.numpy as jnp
import numpy as np
from jax.experimental import pallas as pl
from jax.experimental.pallas import tpu as pltpu

_LANES = 128      # vreg lane width: gate blocks / output hidden dim padded to this
_SUBLANES = 8     # vreg sublane count: batch padded to a multiple of this
_T_CHUNK = 8      # time-chunk size for the per-chunk input projection


def _round_up(x, m):
    return (x + m - 1) // m * m


# --------------------------------------------------------------------------- #
# Kernel
# --------------------------------------------------------------------------- #
def gru_fused_kernel(x_ref, wih_ref, whh_ref, bi_ref, bhn_ref, out_ref, g_ref):
    """Dense (unmasked) GRU over one batch chunk.  Gate order r | z | n.

    x_ref   : (T, Bc, D)    time-major inputs, f32
    wih_ref : (D, 3*Hp)     input->hidden weights, gate-padded, proj dtype
    whh_ref : (Hp, 3*Hp)    hidden->hidden weights, gate-padded, f32
    bi_ref  : (1, 3*Hp)     b_ih + [b_hh_r, b_hh_z, 0], gate-padded, f32
    bhn_ref : (1, Hp)       b_hh_n (kept separate: gated by r), f32
    out_ref : (T, Bc, Hp)   unmasked GRU outputs (padding zeroed in wrapper)
    g_ref   : (Tc, Bc, 3*Hp) VMEM scratch for the current chunk's projection
    """
    T, Bc, D = x_ref.shape
    Hp = whh_ref.shape[0]
    H3p = 3 * Hp
    Tc = g_ref.shape[0]
    n_chunks = T // Tc

    bi = bi_ref[...]       # (1, 3Hp), loaded once
    bhn = bhn_ref[...]     # (1, Hp),  loaded once

    def chunk_body(c, h):
        t0 = pl.multiple_of(c * Tc, Tc)

        # ---- per-chunk hoisted input projection: one (Tc*Bc, D)@(D, 3Hp) MXU matmul
        # (off the recurrence; bounds g_ref to a single chunk -> v7x VMEM friendly).
        xc = x_ref[pl.ds(t0, Tc)].reshape(Tc * Bc, D).astype(wih_ref.dtype)
        gi = jnp.dot(xc, wih_ref[...], preferred_element_type=jnp.float32) + bi
        g_ref[...] = gi.reshape(Tc, Bc, H3p)

        # ---- serial recurrence over the chunk.  No masks, no casts on the carry
        # chain; gate slices are 128-lane aligned; out stores are lane-dense.
        def step(tl, h_prev):
            g_t = g_ref[tl]                                         # (Bc, 3Hp)
            gh = jnp.dot(h_prev, whh_ref[...],                      # single fused MXU push
                         preferred_element_type=jnp.float32)
            r = jax.nn.sigmoid(g_t[:, :Hp] + gh[:, :Hp])
            z = jax.nn.sigmoid(g_t[:, Hp:2 * Hp] + gh[:, Hp:2 * Hp])
            n = jnp.tanh(g_t[:, 2 * Hp:] + r * (gh[:, 2 * Hp:] + bhn))
            h_new = n + z * (h_prev - n)                            # == (1-z)*n + z*h
            out_ref[t0 + tl] = h_new.astype(out_ref.dtype)
            return h_new

        # Fully unrolled inner loop (Tc=8) == partial unroll of the flat time loop.
        return jax.lax.fori_loop(0, Tc, step, h, unroll=True)

    h0 = jnp.zeros((Bc, Hp), jnp.float32)
    jax.lax.fori_loop(0, n_chunks, chunk_body, h0)


# --------------------------------------------------------------------------- #
# pallas_call wrapper
# --------------------------------------------------------------------------- #
def gru_forward_pallas(x_tm, wih_p, whh_p, bi_p, bhn_p, *, batch_chunk):
    """x_tm: (T, B, D) f32 time-major (T % _T_CHUNK == 0, B % batch_chunk == 0).
    Returns (T, B, Hp) f32 unmasked GRU outputs."""
    T, B, D = x_tm.shape
    Hp = whh_p.shape[0]
    H3p = 3 * Hp
    Bc = batch_chunk
    assert T % _T_CHUNK == 0 and B % Bc == 0 and Bc % _SUBLANES == 0 and Hp % _LANES == 0
    grid = (B // Bc,)

    # VMEM budget from actual dtypes: x/out double-buffered by the grid pipeline,
    # projection scratch single chunk, weights resident once.
    isz = lambda a: jnp.dtype(a.dtype).itemsize
    needed = (2 * T * Bc * D * isz(x_tm)
              + 2 * T * Bc * Hp * 4
              + _T_CHUNK * Bc * H3p * 4
              + D * H3p * isz(wih_p) + Hp * H3p * isz(whh_p)
              + H3p * 4 + Hp * 4
              + (1 << 20))                                   # slack
    try:
        phys = int(getattr(pltpu.get_tpu_info(), "vmem_capacity_bytes", 64 << 20))
    except Exception:  # pragma: no cover - conservative fallback (v7x per-core)
        phys = 64 << 20
    cap = (phys * 3) // 4                                    # headroom below physical
    # TODO(synk): if needed > cap (very long T*B), tile the time axis of x/out
    # with a pipelined grid axis instead of keeping them VMEM-resident.
    vmem_limit = int(min(cap, max(8 << 20, needed)))

    return pl.pallas_call(
        gru_fused_kernel,
        out_shape=jax.ShapeDtypeStruct((T, B, Hp), jnp.float32),
        grid_spec=pltpu.PrefetchScalarGridSpec(
            num_scalar_prefetch=0,
            grid=grid,
            in_specs=[
                pl.BlockSpec((T, Bc, D), lambda b: (0, b, 0)),    # x (batch-chunked)
                pl.BlockSpec((D, H3p), lambda b: (0, 0)),         # W_ih (resident)
                pl.BlockSpec((Hp, H3p), lambda b: (0, 0)),        # W_hh (resident)
                pl.BlockSpec((1, H3p), lambda b: (0, 0)),         # fused bias
                pl.BlockSpec((1, Hp), lambda b: (0, 0)),          # b_hh_n
            ],
            out_specs=pl.BlockSpec((T, Bc, Hp), lambda b: (0, b, 0)),
            scratch_shapes=[pltpu.VMEM((_T_CHUNK, Bc, H3p), jnp.float32)],
        ),
        compiler_params=pltpu.CompilerParams(
            dimension_semantics=("parallel",),                    # batch chunks -> v7x TCs
            vmem_limit_bytes=vmem_limit),
    )(x_tm, wih_p, whh_p, bi_p, bhn_p)


def _pack_gru_params(params, Hp, proj_dtype):
    """Gate-pad weights/biases so each gate occupies a full 128-lane block.
    (In production this packing is done once at parameter-load time.)"""
    wih, whh, bih, bhh = params["wih"], params["whh"], params["bih"], params["bhh"]
    H = whh.shape[0]

    def pad_gates(w):  # (..., 3H) -> (..., 3*Hp), gate g at columns [g*Hp, g*Hp+H)
        parts = []
        for g in range(3):
            blk = w[..., g * H:(g + 1) * H]
            pad = [(0, 0)] * (w.ndim - 1) + [(0, Hp - H)]
            parts.append(jnp.pad(blk, pad))
        return jnp.concatenate(parts, axis=-1)

    wih_p = pad_gates(wih).astype(proj_dtype)                             # (D, 3Hp)
    whh_p = jnp.pad(pad_gates(whh), ((0, Hp - H), (0, 0))).astype(jnp.float32)  # (Hp, 3Hp)
    # fold b_hh_r / b_hh_z into the projection bias; b_hh_n stays separate (gated by r)
    b_comb = jnp.concatenate([bih[:2 * H] + bhh[:2 * H], bih[2 * H:]])
    bi_p = pad_gates(b_comb[None, :]).astype(jnp.float32)                 # (1, 3Hp)
    bhn_p = jnp.pad(bhh[2 * H:], (0, Hp - H))[None, :].astype(jnp.float32)  # (1, Hp)
    return wih_p, whh_p, bi_p, bhn_p


def _choose_batch(B):
    """Pad B to full sublanes; split into two 'parallel' grid chunks (v7x megacore)
    only when each chunk keeps >= 128 rows (throughput regime -> harmless on 1-TC chips)."""
    B_pad = _round_up(max(B, _SUBLANES), _SUBLANES)
    if B_pad >= 256:
        B_pad = _round_up(B_pad, 2 * _SUBLANES)
        return B_pad, B_pad // 2
    return B_pad, B_pad


def hybrid_policy_forward(S, seq_lens_host, params, *, proj_dtype=jnp.float32):
    """Matches HybridActionRNNPolicy.forward: padded GRU features of shape
    (B, max(seq_lens), hidden).  excl_head / ind_head belong to .logits().
    proj_dtype only affects the hoisted input projection (recurrence stays f32);
    keep it f32 on v5e."""
    B, T_in, D = S.shape
    H = params["whh"].shape[0]
    Hp = _round_up(H, _LANES)

    lens = np.asarray(seq_lens_host, dtype=np.int32)
    t_max = int(lens.max())                       # pad_packed_sequence pads to max len
    T_pad = _round_up(t_max, _T_CHUNK)            # bucketed: bounds recompiles
    B_pad, Bc = _choose_batch(B)

    wih_p, whh_p, bi_p, bhn_p = _pack_gru_params(params, Hp, proj_dtype)

    # time-major, trimmed to t_max, padded time steps / batch rows are zeros
    x_tm = jnp.transpose(S[:, :t_max, :], (1, 0, 2)).astype(jnp.float32)
    x_tm = jnp.pad(x_tm, ((0, T_pad - t_max), (0, B_pad - B), (0, 0)))

    out_tm = gru_forward_pallas(x_tm, wih_p, whh_p, bi_p, bhn_p, batch_chunk=Bc)

    # pad_packed_sequence semantics: zero positions t >= seq_lens[b].  Done here
    # (not per-step in the kernel) so it fuses with the transpose/slice that is
    # already required for the batch-first interface (jit the wrapper in prod).
    out = jnp.transpose(out_tm, (1, 0, 2))[:B, :t_max, :H]
    mask = jnp.arange(t_max, dtype=jnp.int32)[None, :, None] < jnp.asarray(lens)[:, None, None]
    return jnp.where(mask, out, 0.0)


# --------------------------------------------------------------------------- #
# Pure-JAX reference & demo
# --------------------------------------------------------------------------- #
def gru_forward_reference(S, seq_lens, wih, whh, bih, bhh):
    """Standard un-fused GRU math with packed-sequence masking (torch semantics)."""
    B, T, D = S.shape
    H = whh.shape[0]
    h = jnp.zeros((B, H), jnp.float32)
    outs = []
    for t in range(T):
        x_t = S[:, t, :]
        gi = x_t @ wih + bih
        gh = h @ whh + bhh
        r = jax.nn.sigmoid(gi[:, :H] + gh[:, :H])
        z = jax.nn.sigmoid(gi[:, H:2 * H] + gh[:, H:2 * H])
        n = jnp.tanh(gi[:, 2 * H:] + r * gh[:, 2 * H:])
        h_new = (1.0 - z) * n + z * h
        valid = (seq_lens > t)[:, None]
        h = jnp.where(valid, h_new, h)
        outs.append(jnp.where(valid, h_new, 0.0))
    return jnp.stack(outs, axis=1)


def init_params(key, state_dim, hidden_dim):
    """Deterministic init mirroring torch.nn.GRU: U(-1/sqrt(H), 1/sqrt(H)).
    Weights stored gate-fused: W_ih (D, 3H), W_hh (H, 3H), columns = [r | z | n]."""
    k = 1.0 / math.sqrt(hidden_dim)
    H3 = 3 * hidden_dim
    k1, k2, k3, k4 = jax.random.split(key, 4)
    wih = jax.random.uniform(k1, (state_dim, H3), jnp.float32, -k, k)
    whh = jax.random.uniform(k2, (hidden_dim, H3), jnp.float32, -k, k)
    bih = jax.random.uniform(k3, (H3,), jnp.float32, -k, k)
    bhh = jax.random.uniform(k4, (H3,), jnp.float32, -k, k)
    # TODO(synk): excl_head / ind_head linear layers belong to .logits(), not
    # .forward(); not part of the forward pass implemented here.
    return {"wih": wih, "whh": whh, "bih": bih, "bhh": bhh}


if __name__ == "__main__":
    B, T, state_dim, hidden_dim = 4, 8, 8, 32
    key = jax.random.PRNGKey(0)
    k_params, k_data = jax.random.split(key)

    params = init_params(k_params, state_dim, hidden_dim)
    S = jax.random.normal(k_data, (B, T, state_dim), jnp.float32)
    seq_lens_host = [6, 8, 3, 5]                  # unsorted: enforce_sorted=False

    # f32 path (tight comparison vs. reference)
    out = hybrid_policy_forward(S, seq_lens_host, params)
    out = jax.block_until_ready(out)

    ref = gru_forward_reference(S, jnp.asarray(seq_lens_host, jnp.int32),
                                params["wih"], params["whh"],
                                params["bih"], params["bhh"])
    ref = ref[:, :int(max(seq_lens_host)), :]
    np.testing.assert_allclose(np.asarray(out), np.asarray(ref),
                               rtol=1e-4, atol=1e-4)
    assert out.shape == (B, max(seq_lens_host), hidden_dim)

    # bf16 projection path (recurrence/carry stay f32; use on v6e/v7x only)
    out_bf16 = hybrid_policy_forward(S, seq_lens_host, params,
                                     proj_dtype=jnp.bfloat16)
    out_bf16 = jax.block_until_ready(out_bf16)
    np.testing.assert_allclose(np.asarray(out_bf16), np.asarray(ref),
                               rtol=1e-1, atol=1e-1)

    print("KERNEL_OK")
</pallas_src>

<mosaic_0001>
module attributes {stable_mosaic.version = 11 : i64} {
  func.func @gru_fused_kernel(%arg0: i32, %arg1: memref<8x8x8xf32, #tpu.memory_space<vmem>>, %arg2: memref<8x384xf32, #tpu.memory_space<vmem>>, %arg3: memref<128x384xf32, #tpu.memory_space<vmem>>, %arg4: memref<1x384xf32, #tpu.memory_space<vmem>>, %arg5: memref<1x128xf32, #tpu.memory_space<vmem>>, %arg6: memref<8x8x128xf32, #tpu.memory_space<vmem>>, %arg7: memref<8x8x384xf32, #tpu.memory_space<vmem>>) attributes {dimension_semantics = [#tpu.dimension_semantics<parallel>], iteration_bounds = array<i64: 1>, scalar_prefetch = 0 : i64, scratch_operands = 1 : i64, tpu.core_type = #tpu.core_type<tc>, window_params = [{transform_indices = @transform_0, window_bounds = array<i64: 8, 8, 8>}, {pipeline_mode = #tpu.pipeline_mode<synchronous>, transform_indices = @transform_1, window_bounds = array<i64: 8, 384>}, {pipeline_mode = #tpu.pipeline_mode<synchronous>, transform_indices = @transform_2, window_bounds = array<i64: 128, 384>}, {pipeline_mode = #tpu.pipeline_mode<synchronous>, transform_indices = @transform_3, window_bounds = array<i64: 1, 384>}, {pipeline_mode = #tpu.pipeline_mode<synchronous>, transform_indices = @transform_4, window_bounds = array<i64: 1, 128>}, {transform_indices = @transform_5, window_bounds = array<i64: 8, 8, 128>}]} {
    %c0 = arith.constant 0 : index
    %c0_0 = arith.constant 0 : index
    %0 = vector.load %arg4[%c0, %c0_0] : memref<1x384xf32, #tpu.memory_space<vmem>>, vector<1x384xf32>
    %c0_1 = arith.constant 0 : index
    %c0_2 = arith.constant 0 : index
    %1 = vector.load %arg5[%c0_1, %c0_2] : memref<1x128xf32, #tpu.memory_space<vmem>>, vector<1x128xf32>
    %cst = arith.constant 0.000000e+00 : f32
    %2 = vector.broadcast %cst : f32 to vector<8x128xf32>
    %c0_i32 = arith.constant 0 : i32
    %c8_i32 = arith.constant 8 : i32
    %3 = arith.muli %c0_i32, %c8_i32 : i32
    %4 = tpu.assume_multiple %3, 8 : i32
    %5 = arith.index_cast %4 : i32 to index
    %c0_3 = arith.constant 0 : index
    %c0_4 = arith.constant 0 : index
    %6 = vector.load %arg1[%5, %c0_3, %c0_4] : memref<8x8x8xf32, #tpu.memory_space<vmem>>, vector<8x8x8xf32>
    %7 = vector.shape_cast %6 : vector<8x8x8xf32> to vector<64x8xf32>
    %c0_5 = arith.constant 0 : index
    %c0_6 = arith.constant 0 : index
    %8 = vector.load %arg2[%c0_5, %c0_6] : memref<8x384xf32, #tpu.memory_space<vmem>>, vector<8x384xf32>
    %cst_7 = arith.constant dense<0.000000e+00> : vector<64x384xf32>
    %9 = tpu.matmul %7, %8, %cst_7 {dimension_numbers = #tpu.dot_dimension_numbers<[1], [0], [0], [1], [0, 0, 1, 1], [], []>} : vector<64x8xf32>, vector<8x384xf32>, vector<64x384xf32> -> vector<64x384xf32>
    %10 = vector.broadcast %0 : vector<1x384xf32> to vector<64x384xf32>
    %11 = arith.addf %9, %10 : vector<64x384xf32>
    %12 = vector.shape_cast %11 : vector<64x384xf32> to vector<8x8x384xf32>
    %c0_8 = arith.constant 0 : index
    %c0_9 = arith.constant 0 : index
    %c0_10 = arith.constant 0 : index
    %13 = vector.load %arg7[%c0_8, %c0_9, %c0_10] : memref<8x8x384xf32, #tpu.memory_space<vmem>>, vector<8x8x384xf32>
    tpu.vector_store %arg7[%c0_8, %c0_9, %c0_10], %12 {strides = array<i32>} : memref<8x8x384xf32, #tpu.memory_space<vmem>>, vector<8x8x384xf32>,
    %c0_i32_11 = arith.constant 0 : i32
    %14 = arith.index_cast %c0_i32_11 : i32 to index
    %c0_12 = arith.constant 0 : index
    %c0_13 = arith.constant 0 : index
    %15 = vector.load %arg7[%14, %c0_12, %c0_13] : memref<8x8x384xf32, #tpu.memory_space<vmem>>, vector<1x8x384xf32>
    %16 = vector.shape_cast %15 : vector<1x8x384xf32> to vector<8x384xf32>
    %c0_14 = arith.constant 0 : index
    %c0_15 = arith.constant 0 : index
    %17 = vector.load %arg3[%c0_14, %c0_15] : memref<128x384xf32, #tpu.memory_space<vmem>>, vector<128x384xf32>
    %cst_16 = arith.constant dense<0.000000e+00> : vector<8x384xf32>
    %18 = tpu.matmul %2, %17, %cst_16 {dimension_numbers = #tpu.dot_dimension_numbers<[1], [0], [0], [1], [0, 0, 1, 1], [], []>} : vector<8x128xf32>, vector<128x384xf32>, vector<8x384xf32> -> vector<8x384xf32>
    %19 = vector.extract_strided_slice %16 {offsets = [0, 0], sizes = [8, 128], strides = [1, 1]} : vector<8x384xf32> to vector<8x128xf32>
    %20 = vector.extract_strided_slice %18 {offsets = [0, 0], sizes = [8, 128], strides = [1, 1]} : vector<8x384xf32> to vector<8x128xf32>
    %21 = arith.addf %19, %20 : vector<8x128xf32>
    %22 = arith.negf %21 : vector<8x128xf32>
    %23 = math.exp %22 : vector<8x128xf32>
    %cst_17 = arith.constant 1.000000e+00 : f32
    %24 = vector.broadcast %cst_17 : f32 to vector<8x128xf32>
    %25 = arith.addf %24, %23 : vector<8x128xf32>
    %26 = arith.divf %24, %25 : vector<8x128xf32>
    %27 = vector.extract_strided_slice %16 {offsets = [0, 128], sizes = [8, 128], strides = [1, 1]} : vector<8x384xf32> to vector<8x128xf32>
    %28 = vector.extract_strided_slice %18 {offsets = [0, 128], sizes = [8, 128], strides = [1, 1]} : vector<8x384xf32> to vector<8x128xf32>
    %29 = arith.addf %27, %28 : vector<8x128xf32>
    %30 = arith.negf %29 : vector<8x128xf32>
    %31 = math.exp %30 : vector<8x128xf32>
    %cst_18 = arith.constant 1.000000e+00 : f32
    %32 = vector.broadcast %cst_18 : f32 to vector<8x128xf32>
    %33 = arith.addf %32, %31 : vector<8x128xf32>
    %34 = arith.divf %32, %33 : vector<8x128xf32>
    %35 = vector.extract_strided_slice %16 {offsets = [0, 256], sizes = [8, 128], strides = [1, 1]} : vector<8x384xf32> to vector<8x128xf32>
    %36 = vector.extract_strided_slice %18 {offsets = [0, 256], sizes = [8, 128], strides = [1, 1]} : vector<8x384xf32> to vector<8x128xf32>
    %37 = vector.broadcast %1 : vector<1x128xf32> to vector<8x128xf32>
    %38 = arith.addf %36, %37 : vector<8x128xf32>
    %39 = arith.mulf %26, %38 : vector<8x128xf32>
    %40 = arith.addf %35, %39 : vector<8x128xf32>
    %41 = math.tanh %40 : vector<8x128xf32>
    %42 = arith.subf %2, %41 : vector<8x128xf32>
    %43 = arith.mulf %34, %42 : vector<8x128xf32>
    %44 = arith.addf %41, %43 : vector<8x128xf32>
    %45 = arith.addi %4, %c0_i32_11 : i32
    %46 = arith.index_cast %45 : i32 to index
    %c0_19 = arith.constant 0 : index
    %c0_20 = arith.constant 0 : index
    %47 = vector.load %arg6[%46, %c0_19, %c0_20] : memref<8x8x128xf32, #tpu.memory_space<vmem>>, vector<1x8x128xf32>
    %48 = vector.shape_cast %47 : vector<1x8x128xf32> to vector<8x128xf32>
    %49 = vector.shape_cast %44 : vector<8x128xf32> to vector<1x8x128xf32>
    tpu.vector_store %arg6[%46, %c0_19, %c0_20], %49 {strides = array<i32>} : memref<8x8x128xf32, #tpu.memory_space<vmem>>, vector<1x8x128xf32>,
    %c1_i32 = arith.constant 1 : i32
    %50 = arith.index_cast %c1_i32 : i32 to index
    %c0_21 = arith.constant 0 : index
    %c0_22 = arith.constant 0 : index
    %51 = vector.load %arg7[%50, %c0_21, %c0_22] : memref<8x8x384xf32, #tpu.memory_space<vmem>>, vector<1x8x384xf32>
    %52 = vector.shape_cast %51 : vector<1x8x384xf32> to vector<8x384xf32>
    %c0_23 = arith.constant 0 : index
    %c0_24 = arith.constant 0 : index
    %53 = vector.load %arg3[%c0_23, %c0_24] : memref<128x384xf32, #tpu.memory_space<vmem>>, vector<128x384xf32>
    %cst_25 = arith.constant dense<0.000000e+00> : vector<8x384xf32>
    %54 = tpu.matmul %44, %53, %cst_25 {dimension_numbers = #tpu.dot_dimension_numbers<[1], [0], [0], [1], [0, 0, 1, 1], [], []>} : vector<8x128xf32>, vector<128x384xf32>, vector<8x384xf32> -> vector<8x384xf32>
    %55 = vector.extract_strided_slice %52 {offsets = [0, 0], sizes = [8, 128], strides = [1, 1]} : vector<8x384xf32> to vector<8x128xf32>
    %56 = vector.extract_strided_slice %54 {offsets = [0, 0], sizes = [8, 128], strides = [1, 1]} : vector<8x384xf32> to vector<8x128xf32>
    %57 = arith.addf %55, %56 : vector<8x128xf32>
    %58 = arith.negf %57 : vector<8x128xf32>
    %59 = math.exp %58 : vector<8x128xf32>
    %cst_26 = arith.constant 1.000000e+00 : f32
    %60 = vector.broadcast %cst_26 : f32 to vector<8x128xf32>
    %61 = arith.addf %60, %59 : vector<8x128xf32>
    %62 = arith.divf %60, %61 : vector<8x128xf32>
    %63 = vector.extract_strided_slice %52 {offsets = [0, 128], sizes = [8, 128], strides = [1, 1]} : vector<8x384xf32> to vector<8x128xf32>
    %64 = vector.extract_strided_slice %54 {offsets = [0, 128], sizes = [8, 128], strides = [1, 1]} : vector<8x384xf32> to vector<8x128xf32>
    %65 = arith.addf %63, %64 : vector<8x128xf32>
    %66 = arith.negf %65 : vector<8x128xf32>
    %67 = math.exp %66 : vector<8x128xf32>
    %cst_27 = arith.constant 1.000000e+00 : f32
    %68 = vector.broadcast %cst_27 : f32 to vector<8x128xf32>
    %69 = arith.addf %68, %67 : vector<8x128xf32>
    %70 = arith.divf %68, %69 : vector<8x128xf32>
    %71 = vector.extract_strided_slice %52 {offsets = [0, 256], sizes = [8, 128], strides = [1, 1]} : vector<8x384xf32> to vector<8x128xf32>
    %72 = vector.extract_strided_slice %54 {offsets = [0, 256], sizes = [8, 128], strides = [1, 1]} : vector<8x384xf32> to vector<8x128xf32>
    %73 = vector.broadcast %1 : vector<1x128xf32> to vector<8x128xf32>
    %74 = arith.addf %72, %73 : vector<8x128xf32>
    %75 = arith.mulf %62, %74 : vector<8x128xf32>
    %76 = arith.addf %71, %75 : vector<8x128xf32>
    %77 = math.tanh %76 : vector<8x128xf32>
    %78 = arith.subf %44, %77 : vector<8x128xf32>
    %79 = arith.mulf %70, %78 : vector<8x128xf32>
    %80 = arith.addf %77, %79 : vector<8x128xf32>
    %81 = arith.addi %4, %c1_i32 : i32
    %82 = arith.index_cast %81 : i32 to index
    %c0_28 = arith.constant 0 : index
    %c0_29 = arith.constant 0 : index
    %83 = vector.load %arg6[%82, %c0_28, %c0_29] : memref<8x8x128xf32, #tpu.memory_space<vmem>>, vector<1x8x128xf32>
    %84 = vector.shape_cast %83 : vector<1x8x128xf32> to vector<8x128xf32>
    %85 = vector.shape_cast %80 : vector<8x128xf32> to vector<1x8x128xf32>
    tpu.vector_store %arg6[%82, %c0_28, %c0_29], %85 {strides = array<i32>} : memref<8x8x128xf32, #tpu.memory_space<vmem>>, vector<1x8x128xf32>,
    %c2_i32 = arith.constant 2 : i32
    %86 = arith.index_cast %c2_i32 : i32 to index
    %c0_30 = arith.constant 0 : index
    %c0_31 = arith.constant 0 : index
    %87 = vector.load %arg7[%86, %c0_30, %c0_31] : memref<8x8x384xf32, #tpu.memory_space<vmem>>, vector<1x8x384xf32>
    %88 = vector.shape_cast %87 : vector<1x8x384xf32> to vector<8x384xf32>
    %c0_32 = arith.constant 0 : index
    %c0_33 = arith.constant 0 : index
    %89 = vector.load %arg3[%c0_32, %c0_33] : memref<128x384xf32, #tpu.memory_space<vmem>>, vector<128x384xf32>
    %cst_34 = arith.constant dense<0.000000e+00> : vector<8x384xf32>
    %90 = tpu.matmul %80, %89, %cst_34 {dimension_numbers = #tpu.dot_dimension_numbers<[1], [0], [0], [1], [0, 0, 1, 1], [], []>} : vector<8x128xf32>, vector<128x384xf32>, vector<8x384xf32> -> vector<8x384xf32>
    %91 = vector.extract_strided_slice %88 {offsets = [0, 0], sizes = [8, 128], strides = [1, 1]} : vector<8x384xf32> to vector<8x128xf32>
    %92 = vector.extract_strided_slice %90 {offsets = [0, 0], sizes = [8, 128], strides = [1, 1]} : vector<8x384xf32> to vector<8x128xf32>
    %93 = arith.addf %91, %92 : vector<8x128xf32>
    %94 = arith.negf %93 : vector<8x128xf32>
    %95 = math.exp %94 : vector<8x128xf32>
    %cst_35 = arith.constant 1.000000e+00 : f32
    %96 = vector.broadcast %cst_35 : f32 to vector<8x128xf32>
    %97 = arith.addf %96, %95 : vector<8x128xf32>
    %98 = arith.divf %96, %97 : vector<8x128xf32>
    %99 = vector.extract_strided_slice %88 {offsets = [0, 128], sizes = [8, 128], strides = [1, 1]} : vector<8x384xf32> to vector<8x128xf32>
    %100 = vector.extract_strided_slice %90 {offsets = [0, 128], sizes = [8, 128], strides = [1, 1]} : vector<8x384xf32> to vector<8x128xf32>
    %101 = arith.addf %99, %100 : vector<8x128xf32>
    %102 = arith.negf %101 : vector<8x128xf32>
    %103 = math.exp %102 : vector<8x128xf32>
    %cst_36 = arith.constant 1.000000e+00 : f32
    %104 = vector.broadcast %cst_36 : f32 to vector<8x128xf32>
    %105 = arith.addf %104, %103 : vector<8x128xf32>
    %106 = arith.divf %104, %105 : vector<8x128xf32>
    %107 = vector.extract_strided_slice %88 {offsets = [0, 256], sizes = [8, 128], strides = [1, 1]} : vector<8x384xf32> to vector<8x128xf32>
    %108 = vector.extract_strided_slice %90 {offsets = [0, 256], sizes = [8, 128], strides = [1, 1]} : vector<8x384xf32> to vector<8x128xf32>
    %109 = vector.broadcast %1 : vector<1x128xf32> to vector<8x128xf32>
    %110 = arith.addf %108, %109 : vector<8x128xf32>
    %111 = arith.mulf %98, %110 : vector<8x128xf32>
    %112 = arith.addf %107, %111 : vector<8x128xf32>
    %113 = math.tanh %112 : vector<8x128xf32>
    %114 = arith.subf %80, %113 : vector<8x128xf32>
    %115 = arith.mulf %106, %114 : vector<8x128xf32>
    %116 = arith.addf %113, %115 : vector<8x128xf32>
    %117 = arith.addi %4, %c2_i32 : i32
    %118 = arith.index_cast %117 : i32 to index
    %c0_37 = arith.constant 0 : index
    %c0_38 = arith.constant 0 : index
    %119 = vector.load %arg6[%118, %c0_37, %c0_38] : memref<8x8x128xf32, #tpu.memory_space<vmem>>, vector<1x8x128xf32>
    %120 = vector.shape_cast %119 : vector<1x8x128xf32> to vector<8x128xf32>
    %121 = vector.shape_cast %116 : vector<8x128xf32> to vector<1x8x128xf32>
    tpu.vector_store %arg6[%118, %c0_37, %c0_38], %121 {strides = array<i32>} : memref<8x8x128xf32, #tpu.memory_space<vmem>>, vector<1x8x128xf32>,
    %c3_i32 = arith.constant 3 : i32
    %122 = arith.index_cast %c3_i32 : i32 to index
    %c0_39 = arith.constant 0 : index
    %c0_40 = arith.constant 0 : index
    %123 = vector.load %arg7[%122, %c0_39, %c0_40] : memref<8x8x384xf32, #tpu.memory_space<vmem>>, vector<1x8x384xf32>
    %124 = vector.shape_cast %123 : vector<1x8x384xf32> to vector<8x384xf32>
    %c0_41 = arith.constant 0 : index
    %c0_42 = arith.constant 0 : index
    %125 = vector.load %arg3[%c0_41, %c0_42] : memref<128x384xf32, #tpu.memory_space<vmem>>, vector<128x384xf32>
    %cst_43 = arith.constant dense<0.000000e+00> : vector<8x384xf32>
    %126 = tpu.matmul %116, %125, %cst_43 {dimension_numbers = #tpu.dot_dimension_numbers<[1], [0], [0], [1], [0, 0, 1, 1], [], []>} : vector<8x128xf32>, vector<128x384xf32>, vector<8x384xf32> -> vector<8x384xf32>
    %127 = vector.extract_strided_slice %124 {offsets = [0, 0], sizes = [8, 128], strides = [1, 1]} : vector<8x384xf32> to vector<8x128xf32>
    %128 = vector.extract_strided_slice %126 {offsets = [0, 0], sizes = [8, 128], strides = [1, 1]} : vector<8x384xf32> to vector<8x128xf32>
    %129 = arith.addf %127, %128 : vector<8x128xf32>
    %130 = arith.negf %129 : vector<8x128xf32>
    %131 = math.exp %130 : vector<8x128xf32>
    %cst_44 = arith.constant 1.000000e+00 : f32
    %132 = vector.broadcast %cst_44 : f32 to vector<8x128xf32>
    %133 = arith.addf %132, %131 : vector<8x128xf32>
    %134 = arith.divf %132, %133 : vector<8x128xf32>
    %135 = vector.extract_strided_slice %124 {offsets = [0, 128], sizes = [8, 128], strides = [1, 1]} : vector<8x384xf32> to vector<8x128xf32>
    %136 = vector.extract_strided_slice %126 {offsets = [0, 128], sizes = [8, 128], strides = [1, 1]} : vector<8x384xf32> to vector<8x128xf32>
    %137 = arith.addf %135, %136 : vector<8x128xf32>
    %138 = arith.negf %137 : vector<8x128xf32>
    %139 = math.exp %138 : vector<8x128xf32>
    %cst_45 = arith.constant 1.000000e+00 : f32
    %140 = vector.broadcast %cst_45 : f32 to vector<8x128xf32>
    %141 = arith.addf %140, %139 : vector<8x128xf32>
    %142 = arith.divf %140, %141 : vector<8x128xf32>
    %143 = vector.extract_strided_slice %124 {offsets = [0, 256], sizes = [8, 128], strides = [1, 1]} : vector<8x384xf32> to vector<8x128xf32>
    %144 = vector.extract_strided_slice %126 {offsets = [0, 256], sizes = [8, 128], strides = [1, 1]} : vector<8x384xf32> to vector<8x128xf32>
    %145 = vector.broadcast %1 : vector<1x128xf32> to vector<8x128xf32>
    %146 = arith.addf %144, %145 : vector<8x128xf32>
    %147 = arith.mulf %134, %146 : vector<8x128xf32>
    %148 = arith.addf %143, %147 : vector<8x128xf32>
    %149 = math.tanh %148 : vector<8x128xf32>
    %150 = arith.subf %116, %149 : vector<8x128xf32>
    %151 = arith.mulf %142, %150 : vector<8x128xf32>
    %152 = arith.addf %149, %151 : vector<8x128xf32>
    %153 = arith.addi %4, %c3_i32 : i32
    %154 = arith.index_cast %153 : i32 to index
    %c0_46 = arith.constant 0 : index
    %c0_47 = arith.constant 0 : index
    %155 = vector.load %arg6[%154, %c0_46, %c0_47] : memref<8x8x128xf32, #tpu.memory_space<vmem>>, vector<1x8x128xf32>
    %156 = vector.shape_cast %155 : vector<1x8x128xf32> to vector<8x128xf32>
    %157 = vector.shape_cast %152 : vector<8x128xf32> to vector<1x8x128xf32>
    tpu.vector_store %arg6[%154, %c0_46, %c0_47], %157 {strides = array<i32>} : memref<8x8x128xf32, #tpu.memory_space<vmem>>, vector<1x8x128xf32>,
    %c4_i32 = arith.constant 4 : i32
    %158 = arith.index_cast %c4_i32 : i32 to index
    %c0_48 = arith.constant 0 : index
    %c0_49 = arith.constant 0 : index
    %159 = vector.load %arg7[%158, %c0_48, %c0_49] : memref<8x8x384xf32, #tpu.memory_space<vmem>>, vector<1x8x384xf32>
    %160 = vector.shape_cast %159 : vector<1x8x384xf32> to vector<8x384xf32>
    %c0_50 = arith.constant 0 : index
    %c0_51 = arith.constant 0 : index
    %161 = vector.load %arg3[%c0_50, %c0_51] : memref<128x384xf32, #tpu.memory_space<vmem>>, vector<128x384xf32>
    %cst_52 = arith.constant dense<0.000000e+00> : vector<8x384xf32>
    %162 = tpu.matmul %152, %161, %cst_52 {dimension_numbers = #tpu.dot_dimension_numbers<[1], [0], [0], [1], [0, 0, 1, 1], [], []>} : vector<8x128xf32>, vector<128x384xf32>, vector<8x384xf32> -> vector<8x384xf32>
    %163 = vector.extract_strided_slice %160 {offsets = [0, 0], sizes = [8, 128], strides = [1, 1]} : vector<8x384xf32> to vector<8x128xf32>
    %164 = vector.extract_strided_slice %162 {offsets = [0, 0], sizes = [8, 128], strides = [1, 1]} : vector<8x384xf32> to vector<8x128xf32>
    %165 = arith.addf %163, %164 : vector<8x128xf32>
    %166 = arith.negf %165 : vector<8x128xf32>
    %167 = math.exp %166 : vector<8x128xf32>
    %cst_53 = arith.constant 1.000000e+00 : f32
    %168 = vector.broadcast %cst_53 : f32 to vector<8x128xf32>
    %169 = arith.addf %168, %167 : vector<8x128xf32>
    %170 = arith.divf %168, %169 : vector<8x128xf32>
    %171 = vector.extract_strided_slice %160 {offsets = [0, 128], sizes = [8, 128], strides = [1, 1]} : vector<8x384xf32> to vector<8x128xf32>
    %172 = vector.extract_strided_slice %162 {offsets = [0, 128], sizes = [8, 128], strides = [1, 1]} : vector<8x384xf32> to vector<8x128xf32>
    %173 = arith.addf %171, %172 : vector<8x128xf32>
    %174 = arith.negf %173 : vector<8x128xf32>
    %175 = math.exp %174 : vector<8x128xf32>
    %cst_54 = arith.constant 1.000000e+00 : f32
    %176 = vector.broadcast %cst_54 : f32 to vector<8x128xf32>
    %177 = arith.addf %176, %175 : vector<8x128xf32>
    %178 = arith.divf %176, %177 : vector<8x128xf32>
    %179 = vector.extract_strided_slice %160 {offsets = [0, 256], sizes = [8, 128], strides = [1, 1]} : vector<8x384xf32> to vector<8x128xf32>
    %180 = vector.extract_strided_slice %162 {offsets = [0, 256], sizes = [8, 128], strides = [1, 1]} : vector<8x384xf32> to vector<8x128xf32>
    %181 = vector.broadcast %1 : vector<1x128xf32> to vector<8x128xf32>
    %182 = arith.addf %180, %181 : vector<8x128xf32>
    %183 = arith.mulf %170, %182 : vector<8x128xf32>
    %184 = arith.addf %179, %183 : vector<8x128xf32>
    %185 = math.tanh %184 : vector<8x128xf32>
    %186 = arith.subf %152, %185 : vector<8x128xf32>
    %187 = arith.mulf %178, %186 : vector<8x128xf32>
    %188 = arith.addf %185, %187 : vector<8x128xf32>
    %189 = arith.addi %4, %c4_i32 : i32
    %190 = arith.index_cast %189 : i32 to index
    %c0_55 = arith.constant 0 : index
    %c0_56 = arith.constant 0 : index
    %191 = vector.load %arg6[%190, %c0_55, %c0_56] : memref<8x8x128xf32, #tpu.memory_space<vmem>>, vector<1x8x128xf32>
    %192 = vector.shape_cast %191 : vector<1x8x128xf32> to vector<8x128xf32>
    %193 = vector.shape_cast %188 : vector<8x128xf32> to vector<1x8x128xf32>
    tpu.vector_store %arg6[%190, %c0_55, %c0_56], %193 {strides = array<i32>} : memref<8x8x128xf32, #tpu.memory_space<vmem>>, vector<1x8x128xf32>,
    %c5_i32 = arith.constant 5 : i32
    %194 = arith.index_cast %c5_i32 : i32 to index
    %c0_57 = arith.constant 0 : index
    %c0_58 = arith.constant 0 : index
    %195 = vector.load %arg7[%194, %c0_57, %c0_58] : memref<8x8x384xf32, #tpu.memory_space<vmem>>, vector<1x8x384xf32>
    %196 = vector.shape_cast %195 : vector<1x8x384xf32> to vector<8x384xf32>
    %c0_59 = arith.constant 0 : index
    %c0_60 = arith.constant 0 : index
    %197 = vector.load %arg3[%c0_59, %c0_60] : memref<128x384xf32, #tpu.memory_space<vmem>>, vector<128x384xf32>
    %cst_61 = arith.constant dense<0.000000e+00> : vector<8x384xf32>
    %198 = tpu.matmul %188, %197, %cst_61 {dimension_numbers = #tpu.dot_dimension_numbers<[1], [0], [0], [1], [0, 0, 1, 1], [], []>} : vector<8x128xf32>, vector<128x384xf32>, vector<8x384xf32> -> vector<8x384xf32>
    %199 = vector.extract_strided_slice %196 {offsets = [0, 0], sizes = [8, 128], strides = [1, 1]} : vector<8x384xf32> to vector<8x128xf32>
    %200 = vector.extract_strided_slice %198 {offsets = [0, 0], sizes = [8, 128], strides = [1, 1]} : vector<8x384xf32> to vector<8x128xf32>
    %201 = arith.addf %199, %200 : vector<8x128xf32>
    %202 = arith.negf %201 : vector<8x128xf32>
    %203 = math.exp %202 : vector<8x128xf32>
    %cst_62 = arith.constant 1.000000e+00 : f32
    %204 = vector.broadcast %cst_62 : f32 to vector<8x128xf32>
    %205 = arith.addf %204, %203 : vector<8x128xf32>
    %206 = arith.divf %204, %205 : vector<8x128xf32>
    %207 = vector.extract_strided_slice %196 {offsets = [0, 128], sizes = [8, 128], strides = [1, 1]} : vector<8x384xf32> to vector<8x128xf32>
    %208 = vector.extract_strided_slice %198 {offsets = [0, 128], sizes = [8, 128], strides = [1, 1]} : vector<8x384xf32> to vector<8x128xf32>
    %209 = arith.addf %207, %208 : vector<8x128xf32>
    %210 = arith.negf %209 : vector<8x128xf32>
    %211 = math.exp %210 : vector<8x128xf32>
    %cst_63 = arith.constant 1.000000e+00 : f32
    %212 = vector.broadcast %cst_63 : f32 to vector<8x128xf32>
    %213 = arith.addf %212, %211 : vector<8x128xf32>
    %214 = arith.divf %212, %213 : vector<8x128xf32>
    %215 = vector.extract_strided_slice %196 {offsets = [0, 256], sizes = [8, 128], strides = [1, 1]} : vector<8x384xf32> to vector<8x128xf32>
    %216 = vector.extract_strided_slice %198 {offsets = [0, 256], sizes = [8, 128], strides = [1, 1]} : vector<8x384xf32> to vector<8x128xf32>
    %217 = vector.broadcast %1 : vector<1x128xf32> to vector<8x128xf32>
    %218 = arith.addf %216, %217 : vector<8x128xf32>
    %219 = arith.mulf %206, %218 : vector<8x128xf32>
    %220 = arith.addf %215, %219 : vector<8x128xf32>
    %221 = math.tanh %220 : vector<8x128xf32>
    %222 = arith.subf %188, %221 : vector<8x128xf32>
    %223 = arith.mulf %214, %222 : vector<8x128xf32>
    %224 = arith.addf %221, %223 : vector<8x128xf32>
    %225 = arith.addi %4, %c5_i32 : i32
    %226 = arith.index_cast %225 : i32 to index
    %c0_64 = arith.constant 0 : index
    %c0_65 = arith.constant 0 : index
    %227 = vector.load %arg6[%226, %c0_64, %c0_65] : memref<8x8x128xf32, #tpu.memory_space<vmem>>, vector<1x8x128xf32>
    %228 = vector.shape_cast %227 : vector<1x8x128xf32> to vector<8x128xf32>
    %229 = vector.shape_cast %224 : vector<8x128xf32> to vector<1x8x128xf32>
    tpu.vector_store %arg6[%226, %c0_64, %c0_65], %229 {strides = array<i32>} : memref<8x8x128xf32, #tpu.memory_space<vmem>>, vector<1x8x128xf32>,
    %c6_i32 = arith.constant 6 : i32
    %230 = arith.index_cast %c6_i32 : i32 to index
    %c0_66 = arith.constant 0 : index
    %c0_67 = arith.constant 0 : index
    %231 = vector.load %arg7[%230, %c0_66, %c0_67] : memref<8x8x384xf32, #tpu.memory_space<vmem>>, vector<1x8x384xf32>
    %232 = vector.shape_cast %231 : vector<1x8x384xf32> to vector<8x384xf32>
    %c0_68 = arith.constant 0 : index
    %c0_69 = arith.constant 0 : index
    %233 = vector.load %arg3[%c0_68, %c0_69] : memref<128x384xf32, #tpu.memory_space<vmem>>, vector<128x384xf32>
    %cst_70 = arith.constant dense<0.000000e+00> : vector<8x384xf32>
    %234 = tpu.matmul %224, %233, %cst_70 {dimension_numbers = #tpu.dot_dimension_numbers<[1], [0], [0], [1], [0, 0, 1, 1], [], []>} : vector<8x128xf32>, vector<128x384xf32>, vector<8x384xf32> -> vector<8x384xf32>
    %235 = vector.extract_strided_slice %232 {offsets = [0, 0], sizes = [8, 128], strides = [1, 1]} : vector<8x384xf32> to vector<8x128xf32>
    %236 = vector.extract_strided_slice %234 {offsets = [0, 0], sizes = [8, 128], strides = [1, 1]} : vector<8x384xf32> to vector<8x128xf32>
    %237 = arith.addf %235, %236 : vector<8x128xf32>
    %238 = arith.negf %237 : vector<8x128xf32>
    %239 = math.exp %238 : vector<8x128xf32>
    %cst_71 = arith.constant 1.000000e+00 : f32
    %240 = vector.broadcast %cst_71 : f32 to vector<8x128xf32>
    %241 = arith.addf %240, %239 : vector<8x128xf32>
    %242 = arith.divf %240, %241 : vector<8x128xf32>
    %243 = vector.extract_strided_slice %232 {offsets = [0, 128], sizes = [8, 128], strides = [1, 1]} : vector<8x384xf32> to vector<8x128xf32>
    %244 = vector.extract_strided_slice %234 {offsets = [0, 128], sizes = [8, 128], strides = [1, 1]} : vector<8x384xf32> to vector<8x128xf32>
    %245 = arith.addf %243, %244 : vector<8x128xf32>
    %246 = arith.negf %245 : vector<8x128xf32>
    %247 = math.exp %246 : vector<8x128xf32>
    %cst_72 = arith.constant 1.000000e+00 : f32
    %248 = vector.broadcast %cst_72 : f32 to vector<8x128xf32>
    %249 = arith.addf %248, %247 : vector<8x128xf32>
    %250 = arith.divf %248, %249 : vector<8x128xf32>
    %251 = vector.extract_strided_slice %232 {offsets = [0, 256], sizes = [8, 128], strides = [1, 1]} : vector<8x384xf32> to vector<8x128xf32>
    %252 = vector.extract_strided_slice %234 {offsets = [0, 256], sizes = [8, 128], strides = [1, 1]} : vector<8x384xf32> to vector<8x128xf32>
    %253 = vector.broadcast %1 : vector<1x128xf32> to vector<8x128xf32>
    %254 = arith.addf %252, %253 : vector<8x128xf32>
    %255 = arith.mulf %242, %254 : vector<8x128xf32>
    %256 = arith.addf %251, %255 : vector<8x128xf32>
    %257 = math.tanh %256 : vector<8x128xf32>
    %258 = arith.subf %224, %257 : vector<8x128xf32>
    %259 = arith.mulf %250, %258 : vector<8x128xf32>
    %260 = arith.addf %257, %259 : vector<8x128xf32>
    %261 = arith.addi %4, %c6_i32 : i32
    %262 = arith.index_cast %261 : i32 to index
    %c0_73 = arith.constant 0 : index
    %c0_74 = arith.constant 0 : index
    %263 = vector.load %arg6[%262, %c0_73, %c0_74] : memref<8x8x128xf32, #tpu.memory_space<vmem>>, vector<1x8x128xf32>
    %264 = vector.shape_cast %263 : vector<1x8x128xf32> to vector<8x128xf32>
    %265 = vector.shape_cast %260 : vector<8x128xf32> to vector<1x8x128xf32>
    tpu.vector_store %arg6[%262, %c0_73, %c0_74], %265 {strides = array<i32>} : memref<8x8x128xf32, #tpu.memory_space<vmem>>, vector<1x8x128xf32>,
    %c7_i32 = arith.constant 7 : i32
    %266 = arith.index_cast %c7_i32 : i32 to index
    %c0_75 = arith.constant 0 : index
    %c0_76 = arith.constant 0 : index
    %267 = vector.load %arg7[%266, %c0_75, %c0_76] : memref<8x8x384xf32, #tpu.memory_space<vmem>>, vector<1x8x384xf32>
    %268 = vector.shape_cast %267 : vector<1x8x384xf32> to vector<8x384xf32>
    %c0_77 = arith.constant 0 : index
    %c0_78 = arith.constant 0 : index
    %269 = vector.load %arg3[%c0_77, %c0_78] : memref<128x384xf32, #tpu.memory_space<vmem>>, vector<128x384xf32>
    %cst_79 = arith.constant dense<0.000000e+00> : vector<8x384xf32>
    %270 = tpu.matmul %260, %269, %cst_79 {dimension_numbers = #tpu.dot_dimension_numbers<[1], [0], [0], [1], [0, 0, 1, 1], [], []>} : vector<8x128xf32>, vector<128x384xf32>, vector<8x384xf32> -> vector<8x384xf32>
    %271 = vector.extract_strided_slice %268 {offsets = [0, 0], sizes = [8, 128], strides = [1, 1]} : vector<8x384xf32> to vector<8x128xf32>
    %272 = vector.extract_strided_slice %270 {offsets = [0, 0], sizes = [8, 128], strides = [1, 1]} : vector<8x384xf32> to vector<8x128xf32>
    %273 = arith.addf %271, %272 : vector<8x128xf32>
    %274 = arith.negf %273 : vector<8x128xf32>
    %275 = math.exp %274 : vector<8x128xf32>
    %cst_80 = arith.constant 1.000000e+00 : f32
    %276 = vector.broadcast %cst_80 : f32 to vector<8x128xf32>
    %277 = arith.addf %276, %275 : vector<8x128xf32>
    %278 = arith.divf %276, %277 : vector<8x128xf32>
    %279 = vector.extract_strided_slice %268 {offsets = [0, 128], sizes = [8, 128], strides = [1, 1]} : vector<8x384xf32> to vector<8x128xf32>
    %280 = vector.extract_strided_slice %270 {offsets = [0, 128], sizes = [8, 128], strides = [1, 1]} : vector<8x384xf32> to vector<8x128xf32>
    %281 = arith.addf %279, %280 : vector<8x128xf32>
    %282 = arith.negf %281 : vector<8x128xf32>
    %283 = math.exp %282 : vector<8x128xf32>
    %cst_81 = arith.constant 1.000000e+00 : f32
    %284 = vector.broadcast %cst_81 : f32 to vector<8x128xf32>
    %285 = arith.addf %284, %283 : vector<8x128xf32>
    %286 = arith.divf %284, %285 : vector<8x128xf32>
    %287 = vector.extract_strided_slice %268 {offsets = [0, 256], sizes = [8, 128], strides = [1, 1]} : vector<8x384xf32> to vector<8x128xf32>
    %288 = vector.extract_strided_slice %270 {offsets = [0, 256], sizes = [8, 128], strides = [1, 1]} : vector<8x384xf32> to vector<8x128xf32>
    %289 = vector.broadcast %1 : vector<1x128xf32> to vector<8x128xf32>
    %290 = arith.addf %288, %289 : vector<8x128xf32>
    %291 = arith.mulf %278, %290 : vector<8x128xf32>
    %292 = arith.addf %287, %291 : vector<8x128xf32>
    %293 = math.tanh %292 : vector<8x128xf32>
    %294 = arith.subf %260, %293 : vector<8x128xf32>
    %295 = arith.mulf %286, %294 : vector<8x128xf32>
    %296 = arith.addf %293, %295 : vector<8x128xf32>
    %297 = arith.addi %4, %c7_i32 : i32
    %298 = arith.index_cast %297 : i32 to index
    %c0_82 = arith.constant 0 : index
    %c0_83 = arith.constant 0 : index
    %299 = vector.load %arg6[%298, %c0_82, %c0_83] : memref<8x8x128xf32, #tpu.memory_space<vmem>>, vector<1x8x128xf32>
    %300 = vector.shape_cast %299 : vector<1x8x128xf32> to vector<8x128xf32>
    %301 = vector.shape_cast %296 : vector<8x128xf32> to vector<1x8x128xf32>
    tpu.vector_store %arg6[%298, %c0_82, %c0_83], %301 {strides = array<i32>} : memref<8x8x128xf32, #tpu.memory_space<vmem>>, vector<1x8x128xf32>,
    %c8_i32_84 = arith.constant 8 : i32
    %c1_i32_85 = arith.constant 1 : i32
    return
  }
  func.func @transform_0(%arg0: i32) -> (i32, i32, i32) {
    %c0_i32 = arith.constant 0 : i32
    %c0_i32_0 = arith.constant 0 : i32
    %c0_i32_1 = arith.constant 0 : i32
    return %c0_i32, %arg0, %c0_i32_0 : i32, i32, i32
  }
  func.func @transform_1(%arg0: i32) -> (i32, i32) {
    %c0_i32 = arith.constant 0 : i32
    %c0_i32_0 = arith.constant 0 : i32
    %c0_i32_1 = arith.constant 0 : i32
    return %c0_i32, %c0_i32_0 : i32, i32
  }
  func.func @transform_2(%arg0: i32) -> (i32, i32) {
    %c0_i32 = arith.constant 0 : i32
    %c0_i32_0 = arith.constant 0 : i32
    %c0_i32_1 = arith.constant 0 : i32
    return %c0_i32, %c0_i32_0 : i32, i32
  }
  func.func @transform_3(%arg0: i32) -> (i32, i32) {
    %c0_i32 = arith.constant 0 : i32
    %c0_i32_0 = arith.constant 0 : i32
    %c0_i32_1 = arith.constant 0 : i32
    return %c0_i32, %c0_i32_0 : i32, i32
  }
  func.func @transform_4(%arg0: i32) -> (i32, i32) {
    %c0_i32 = arith.constant 0 : i32
    %c0_i32_0 = arith.constant 0 : i32
    %c0_i32_1 = arith.constant 0 : i32
    return %c0_i32, %c0_i32_0 : i32, i32
  }
  func.func @transform_5(%arg0: i32) -> (i32, i32, i32) {
    %c0_i32 = arith.constant 0 : i32
    %c0_i32_0 = arith.constant 0 : i32
    %c0_i32_1 = arith.constant 0 : i32
    return %c0_i32, %arg0, %c0_i32_0 : i32, i32, i32
  }
}

</mosaic_0001>

<bundles_post_ra>
// kernel: tpu_custom_call.1
= control target key start
LH: loop header
LB: loop body
LE: loop exit
PB: predicated region body
PF: predicated region fallthrough
CT: control target
= control target key end

     0   :  { %10 = vsyncpa [#allocation4], 0  ;;  %s3709_s0 = inlined_call_operand.hbm [shape: f32[8,8,8], index: 0, kind: input, shape index: {}]   ;;  %s3710_s1 = inlined_call_operand.hbm [shape: f32[8,384], index: 1, kind: input, shape index: {}]   ;;  %s3711_s2 = inlined_call_operand.hbm [shape: f32[128,384], index: 2, kind: input, shape index: {}]   ;;  %s3712_s3 = inlined_call_operand.vmem [shape: f32[1,384], index: 3, kind: input, shape index: {}]   ;;  %s3713_s4 = inlined_call_operand.vmem [shape: f32[1,128], index: 4, kind: input, shape index: {}]   ;;  %s3714_s5 = inlined_call_operand.hbm [shape: f32[8,8,128], index: 5, kind: output, shape index: {}]  }
   0x1   :  { %11 = vsyncpa [#allocation7], 0 }
   0x2   :  { %12 = vsyncpa [#allocation5], 0  ;;  %s2779_s18 = smov [#allocation6]   ;;  %s2780_s20 = smov [#allocation3]  }
   0x3   :  { %s31_s19 = sshll.u32 %s2779_s18, 4  ;;  %s18_s21 = sshll.u32 %s2780_s20, 4  ;;  %s32_s19 = int_to_ptr.vmem [resolvable:$true] %s31_s19  ;;  %s19_s21 = int_to_ptr.vmem [resolvable:$true] %s18_s21 }
   0x4   :  { %s2701_s22 = scalar_lea.vmem %s32_s19, 384  ;;  %p2706_p1 = scmp.lt.s32.totalorder %s32_s19, %s32_s19 }
   0x5   :  { %p2702_p0 = scmp.ne.s32.totalorder %s32_s19, %s2701_s22  ;;  %p2707_p2 = scmp.lt.s32.totalorder %s2701_s22, %s2701_s22 }
   0x7   :  { %p2708_p3 = por %p2707_p2, %p2706_p1 }
   0x9   :  { %p2709_p4 = pnand %p2708_p3, %p2702_p0 }
   0xb   :  { %2712 = shalt.err (!%p2709_p4)
}
   0xc   :  { %34 = dma.hbm_to_vmem [thread:$0]  %s3710_s1, 384, %s32_s19, [#allocation7]  }
   0xd   :  { %s2721_s25 = scalar_lea.vmem %s19_s21, 1024  ;;  %p2726_p6 = scmp.lt.s32.totalorder %s19_s21, %s19_s21 }
   0xe   :  { %p2722_p5 = scmp.ne.s32.totalorder %s19_s21, %s2721_s25  ;;  %p2727_p7 = scmp.lt.s32.totalorder %s2721_s25, %s2721_s25 }
  0x10   :  { %p2728_p8 = por %p2727_p7, %p2726_p6 }
  0x12   :  { %p2729_p9 = pnand %p2728_p8, %p2722_p5 }
  0x14   :  { %2732 = shalt.err (!%p2729_p9)
}
  0x15   :  { %s2781_s26 = smov 128   ;;  %s2782_s27 = smov 8  }
  0x16   :  { %24 = dma.hbm_to_vmem [thread:$0]  %s3709_s0, 1024, %s19_s21, [#allocation4], %s2781_s26, %s2781_s26, %s2782_s27  }
  0x17   :  { %s2783_s30 = smov [#allocation8]  }
  0x18   :  { %s40_s6 = sshll.u32 %s2783_s30, 4  ;;  %s41_s6 = int_to_ptr.vmem [resolvable:$true] %s40_s6 }
  0x19   :  { %s2741_s1 = scalar_lea.vmem %s41_s6, 6144  ;;  %p2746_p11 = scmp.lt.s32.totalorder %s41_s6, %s41_s6 }
  0x1a   :  { %p2742_p10 = scmp.ne.s32.totalorder %s41_s6, %s2741_s1  ;;  %p2747_p12 = scmp.lt.s32.totalorder %s2741_s1, %s2741_s1 }
  0x1c   :  { %p2748_p13 = por %p2747_p12, %p2746_p11 }
  0x1e   :  { %p2749_p0 = pnand %p2748_p13, %p2742_p10 }
  0x20   :  { %2752 = shalt.err (!%p2749_p0)
}
  0x21   :  { %s2784_s7 = smov 384   ;;  %s2785_s8 = smov 24  }
  0x22   :  { %46 = dma.hbm_to_vmem [thread:$0]  %s3711_s2, 6144, %s41_s6, [#allocation7], %s2784_s7, %s2784_s7, %s2785_s8  }
  0x23   :  { %2773 = dma.done.wait [#allocation4], 1024  }
  0x24   :  { %2774 = vsyncadd [#allocation4], 4294966272 }
  0x25   :  { %2775 = dma.done.wait [#allocation7], 6528  }
  0x26   :  { %2776 = vsyncadd [#allocation7], 4294960768  ;;  %v3715_v0 = vmov 0.0   ;;  %v73_v1 = vld [vmem:[#allocation6 + $0x8] sm:$0xff]  ;;  %v72_v2 = vld [vmem:[#allocation6] sm:$0xff]  ;;  %vm91_vm0 = vcmask 64512   ;;  %v76_v60 = vlaneseq }
  0x27   :  { %180 = vmatprep.mubr.f32.mxu0 %v3715_v0  ;;  %v64_v3 = vld [vmem:[#allocation3] sm:$0xff]  ;;  %146 = vmatprep.subr.mxu0 %v73_v1  ;;  %v2832_v4 = vld [vmem:[#allocation8 + $0x170] sm:$0xff]  ;;  %v2837_v6 = vld [vmem:[#allocation8 + $0x158] sm:$0xff]  ;;  %vm2787_vm1 = vmmov 0  }
  0x28   :  { %3736 = vst [vmem:[#allocation13_spill] sm:$0xff] %v2832_v4  ;;  %v2834_v5 = vld [vmem:[#allocation8 + $0x168] sm:$0xff]  ;;  %2310 = vmatprep.mubr.msk.f32.mxu1 %vm91_vm0, %v64_v3  ;;  %147 = vmatpush1.msra.mxu0 %v72_v2  ;;  %v2841_v7 = vld [vmem:[#allocation8 + $0x150] sm:$0xff]  ;;  %v2845_v9 = vld [vmem:[#allocation8 + $0x140] sm:$0xff]  ;;  %v77_v61 = vshrl.u32 %v76_v60, 7 }
  0x29   :  { %2130 = vmatmul.mubr.msk.f32.vlgmr.msra.gmra.mxu0 %vm91_vm0, %v64_v3  ;;  %409 = vmatprep.subr.mxu0 %v2832_v4  ;;  %v65_v8 = vld [vmem:[#allocation3 + $0x8] sm:$0xff]  ;;  %v2848_v10 = vld [vmem:[#allocation8 + $0x138] sm:$0xff]  ;;  %v2851_v11 = vld [vmem:[#allocation8 + $0x128] sm:$0xff] }
  0x2a   :  { %410 = vmatpush1.msra.mxu0 %v2834_v5  ;;  %186 = vmatprep.mubr.f32.mxu0 %v3715_v0  ;;  %v2855_v12 = vld [vmem:[#allocation8 + $0x120] sm:$0xff]  ;;  %v2859_v13 = vld [vmem:[#allocation3 + $0x10] sm:$0xff]  ;;  %v2861_v14 = vld [vmem:[#allocation8 + $0x110] sm:$0xff]  ;;  %v78_v62 = vsub.s32 0, %v77_v61  ;;  %v82_v2 = vsub.s32 1, %v77_v61 }
  0x2b   :  { %411 = vmatprep.subr.mxu0 %v2837_v6  ;;  %v2864_v15 = vld [vmem:[#allocation8 + $0x108] sm:$0xff]  ;;  %v2867_v16 = vld [vmem:[#allocation8 + $0xf8] sm:$0xff]  ;;  %v2872_v17 = vld [vmem:[#allocation8 + $0xf0] sm:$0xff] }
  0x2c   :  { %412 = vmatpush1.msra.mxu0 %v2841_v7  ;;  %v2876_v18 = vld [vmem:[#allocation3 + $0x18] sm:$0xff]  ;;  %v2881_v20 = vld [vmem:[#allocation8 + $0xd8] sm:$0xff]  ;;  %v2884_v22 = vld [vmem:[#allocation8 + $0xc8] sm:$0xff] }
  0x2d   :  { %2131 = vmatmul.mubr.msk.f32.gmra.mxu0 %vm91_vm0, %v65_v8  ;;  %413 = vmatprep.subr.mxu0 %v2845_v9  ;;  %v2878_v19 = vld [vmem:[#allocation8 + $0xe0] sm:$0xff]  ;;  %v74_v21 = vld [vmem:[#allocation6 + $0x10] sm:$0xff]  ;;  %v2893_v24 = vld [vmem:[#allocation3 + $0x20] sm:$0xff] }
  0x2e   :  { %414 = vmatpush1.msra.mxu0 %v2848_v10  ;;  %192 = vmatprep.mubr.f32.mxu0 %v3715_v0  ;;  %v2889_v23 = vld [vmem:[#allocation8 + $0xc0] sm:$0xff]  ;;  %v2895_v25 = vld [vmem:[#allocation8 + $0xb0] sm:$0xff]  ;;  %v2898_v26 = vld [vmem:[#allocation8 + $0xa8] sm:$0xff] }
  0x2f   :  { %415 = vmatprep.subr.mxu0 %v2851_v11  ;;  %2308 = vmatprep.subr.mxu1 %v74_v21  ;;  %v2901_v27 = vld [vmem:[#allocation8 + $0x98] sm:$0xff]  ;;  %v2907_v28 = vld [vmem:[#allocation8 + $0x90] sm:$0xff]  ;;  %v2915_v31 = vld [vmem:[#allocation8 + $0x80] sm:$0xff] }
  0x30   :  { %416 = vmatpush1.msra.mxu0 %v2855_v12  ;;  %2309 = vmatpush3.msra.mxu1 %v74_v21  ;;  %v2909_v29 = vld [vmem:[#allocation8 + $0x178] sm:$0xff]  ;;  %v2913_v30 = vld [vmem:[#allocation3 + $0x28] sm:$0xff]  ;;  %v2922_v33 = vld [vmem:[#allocation8 + $0x68] sm:$0xff] }
  0x31   :  { %2132 = vmatmul.mubr.msk.f32.gmra.mxu0 %vm91_vm0, %v2859_v13  ;;  %417 = vmatprep.subr.mxu0 %v2861_v14  ;;  %v2918_v32 = vld [vmem:[#allocation8 + $0x78] sm:$0xff]  ;;  %v2928_v34 = vld [vmem:[#allocation8 + $0x60] sm:$0xff]  ;;  %v2934_v37 = vld [vmem:[#allocation8 + $0x50] sm:$0xff] }
  0x32   :  { %418 = vmatpush1.msra.mxu0 %v2864_v15  ;;  %198 = vmatprep.mubr.f32.mxu0 %v3715_v0  ;;  %v2930_v35 = vld [vmem:[#allocation8 + $0x160] sm:$0xff]  ;;  %v70_v36 = vld [vmem:[#allocation3 + $0x30] sm:$0xff]  ;;  %v2937_v38 = vld [vmem:[#allocation8 + $0x48] sm:$0xff] }
  0x33   :  { %419 = vmatprep.subr.mxu0 %v2867_v16  ;;  %2322 = vmatprep.subr.mxu1 %v3715_v0  ;;  %v2941_v39 = vld [vmem:[#allocation8 + $0x38] sm:$0xff]  ;;  %v2946_v40 = vld [vmem:[#allocation8 + $0x30] sm:$0xff]  ;;  %v2948_v41 = vld [vmem:[#allocation8 + $0x148] sm:$0xff] }
  0x34   :  { %420 = vmatpush1.msra.mxu0 %v2872_v17  ;;  %2311 = vmatmul.mubr.msk.f32.vlgmr.msra.gmra.mxu1 %vm91_vm0, %v65_v8  ;;  %v71_v42 = vld [vmem:[#allocation3 + $0x38] sm:$0xff]  ;;  %v2955_v44 = vld [vmem:[#allocation8 + $0x18] sm:$0xff]  ;;  %v2959_v45 = vld [vmem:[#allocation8 + $0x8] sm:$0xff] }
  0x35   :  { %2133 = vmatmul.mubr.msk.f32.gmra.mxu0 %vm91_vm0, %v2876_v18  ;;  %421 = vmatprep.subr.mxu0 %v2878_v19  ;;  %v2952_v43 = vld [vmem:[#allocation8 + $0x20] sm:$0xff]  ;;  %3737 = vst [vmem:[#allocation14_spill] sm:$0xff] %v2959_v45  ;;  %v2966_v47 = vld [vmem:[#allocation8 + $0x130] sm:$0xff]  ;;  %v2972_v48 = vld [vmem:[#allocation8 + $0x118] sm:$0xff] }
  0x36   :  { %422 = vmatpush1.msra.mxu0 %v2881_v20  ;;  %204 = vmatprep.mubr.f32.mxu0 %v3715_v0  ;;  %v2964_v46 = vld [vmem:[#allocation8] sm:$0xff]  ;;  %v2984_v50 = vld [vmem:[#allocation8 + $0xe8] sm:$0xff]  ;;  %v2992_v51 = vld [vmem:[#allocation8 + $0xd0] sm:$0xff] }
  0x37   :  { %423 = vmatprep.subr.mxu0 %v2884_v22  ;;  %2323 = vmatpush3.msra.mxu1 %v2909_v29  ;;  %3738 = vst [vmem:[#allocation15_spill] sm:$0xff] %v2964_v46  ;;  %v2978_v49 = vld [vmem:[#allocation8 + $0x100] sm:$0xff]  ;;  %v2998_v52 = vld [vmem:[#allocation8 + $0xb8] sm:$0xff]  ;;  %v3011_v54 = vld [vmem:[#allocation8 + $0x88] sm:$0xff] }
  0x38   :  { %424 = vmatpush1.msra.mxu0 %v2889_v23  ;;  %2324 = vmatprep.subr.mxu1 %v3715_v0  ;;  %v3005_v53 = vld [vmem:[#allocation8 + $0xa0] sm:$0xff]  ;;  %v3018_v55 = vld [vmem:[#allocation8 + $0x70] sm:$0xff]  ;;  %v3024_v56 = vld [vmem:[#allocation8 + $0x58] sm:$0xff] }
  0x39   :  { %2134 = vmatmul.mubr.msk.f32.gmra.mxu0 %vm91_vm0, %v2893_v24  ;;  %425 = vmatprep.subr.mxu0 %v2895_v25  ;;  %v3030_v57 = vld [vmem:[#allocation8 + $0x40] sm:$0xff]  ;;  %v3036_v58 = vld [vmem:[#allocation8 + $0x28] sm:$0xff]  ;;  %v3042_v59 = vld [vmem:[#allocation8 + $0x10] sm:$0xff] }
  0x3a   :  { %426 = vmatpush1.msra.mxu0 %v2898_v26  ;;  %210 = vmatprep.mubr.f32.mxu0 %v3715_v0  ;;  %3739 = vst [vmem:[#allocation16_spill] sm:$0xff] %v3036_v58  ;;  %3740 = vst [vmem:[#allocation17_spill] sm:$0xff] %v3042_v59  ;;  %v60_v63 = vld [vmem:[%s3712_s3] sm:$0x7] }
  0x3b   :  { %427 = vmatprep.subr.mxu0 %v2901_v27  ;;  %2325 = vmatpush3.msra.mxu1 %v2930_v35  ;;  %v79_v8 = vrot.slane %v60_v63, %v78_v62 }
  0x3c   :  { %428 = vmatpush1.msra.mxu0 %v2907_v28  ;;  %2326 = vmatprep.subr.mxu1 %v3715_v0 }
  0x3d   :  { %2135 = vmatmul.mubr.msk.f32.gmra.mxu0 %vm91_vm0, %v2913_v30  ;;  %429 = vmatprep.subr.mxu0 %v2915_v31 }
  0x3e   :  { %430 = vmatpush1.msra.mxu0 %v2918_v32  ;;  %216 = vmatprep.mubr.f32.mxu0 %v3715_v0 }
  0x3f   :  { %431 = vmatprep.subr.mxu0 %v2922_v33  ;;  %2327 = vmatpush3.msra.mxu1 %v2948_v41 }
  0x40   :  { %432 = vmatpush1.msra.mxu0 %v2928_v34  ;;  %2328 = vmatprep.subr.mxu1 %v3715_v0 }
  0x41   :  { %2136 = vmatmul.mubr.msk.f32.gmra.mxu0 %vm91_vm0, %v70_v36  ;;  %433 = vmatprep.subr.mxu0 %v2934_v37 }
  0x42   :  { %434 = vmatpush1.msra.mxu0 %v2937_v38  ;;  %222 = vmatprep.mubr.f32.mxu0 %v3715_v0 }
  0x43   :  { %435 = vmatprep.subr.mxu0 %v2941_v39  ;;  %2329 = vmatpush3.msra.mxu1 %v2966_v47 }
  0x44   :  { %436 = vmatpush1.msra.mxu0 %v2946_v40  ;;  %2330 = vmatprep.subr.mxu1 %v3715_v0 }
  0x45   :  { %2137 = vmatmul.mubr.msk.f32.gmra.mxu0 %vm91_vm0, %v71_v42  ;;  %437 = vmatprep.subr.mxu0 %v2952_v43 }
  0x46   :  { %438 = vmatpush1.msra.mxu0 %v2955_v44  ;;  %473 = vmatprep.mubr.f32.mxu0 %v3715_v0 }
  0x47   :  { %439 = vmatprep.subr.mxu0 %v2959_v45  ;;  %2331 = vmatpush3.msra.mxu1 %v2972_v48 }
  0x48   :  { %440 = vmatpush1.msra.mxu0 %v2964_v46  ;;  %2313 = vmatprep.mubr.msk.f32.mxu1 %vm91_vm0, %v2859_v13 }
  0x49   :  { %474 = vmatmul.mubr.f32.vlgmr.msra.gmra.mxu0 %v3715_v0  ;;  %2332 = vmatprep.subr.mxu1 %v3715_v0 }
  0x4a   :  { %2314 = vmatmul.mubr.msk.f32.gmra.mxu1 %vm91_vm0, %v2876_v18  ;;  %631 = vmatprep.subr.mxu0 %v2832_v4  ;;  %v83_v18 = vrot.slane %v60_v63, %v82_v2 }
  0x4b   :  { %2333 = vmatpush3.msra.mxu1 %v2978_v49  ;;  %2316 = vmatprep.mubr.msk.f32.mxu1 %vm91_vm0, %v2893_v24 }
  0x4c   :  { %2334 = vmatprep.subr.mxu1 %v3715_v0  ;;  %632 = vmatpush1.msra.mxu0 %v2834_v5 }
  0x4d   :  { %2335 = vmatpush3.msra.mxu1 %v2984_v50  ;;  %633 = vmatprep.subr.mxu0 %v2837_v6 }
  0x4e   :  { %2336 = vmatprep.subr.mxu1 %v3715_v0  ;;  %2317 = vmatmul.mubr.msk.f32.gmra.mxu1 %vm91_vm0, %v2913_v30 }
  0x4f   :  { %2337 = vmatpush3.msra.mxu1 %v2992_v51  ;;  %2319 = vmatprep.mubr.msk.f32.mxu1 %vm91_vm0, %v70_v36 }
  0x50   :  { %2338 = vmatprep.subr.mxu1 %v3715_v0  ;;  %634 = vmatpush1.msra.mxu0 %v2841_v7 }
  0x51   :  { %2339 = vmatpush3.msra.mxu1 %v2998_v52  ;;  %635 = vmatprep.subr.mxu0 %v2845_v9 }
  0x52   :  { %2340 = vmatprep.subr.mxu1 %v3715_v0  ;;  %2320 = vmatmul.mubr.msk.f32.gmra.mxu1 %vm91_vm0, %v71_v42 }
  0x53   :  { %2341 = vmatpush3.msra.mxu1 %v3005_v53  ;;  %2354 = vmatprep.mubr.msk.f32.mxu1 %vm2787_vm1, %v3715_v0 }
  0x54   :  { %2342 = vmatprep.subr.mxu1 %v3715_v0  ;;  %636 = vmatpush1.msra.mxu0 %v2848_v10 }
  0x55   :  { %2343 = vmatpush3.msra.mxu1 %v3011_v54  ;;  %637 = vmatprep.subr.mxu0 %v2851_v11 }
  0x56   :  { %2344 = vmatprep.subr.mxu1 %v3715_v0  ;;  %638 = vmatpush1.msra.mxu0 %v2855_v12 }
  0x57   :  { %2345 = vmatpush3.msra.mxu1 %v3018_v55  ;;  %639 = vmatprep.subr.mxu0 %v2861_v14 }
  0x58   :  { %2346 = vmatprep.subr.mxu1 %v3715_v0  ;;  %640 = vmatpush1.msra.mxu0 %v2864_v15 }
  0x59   :  { %2347 = vmatpush3.msra.mxu1 %v3024_v56  ;;  %641 = vmatprep.subr.mxu0 %v2867_v16 }
  0x5a   :  { %2348 = vmatprep.subr.mxu1 %v3715_v0  ;;  %642 = vmatpush1.msra.mxu0 %v2872_v17 }
  0x5b   :  { %2349 = vmatpush3.msra.mxu1 %v3030_v57  ;;  %643 = vmatprep.subr.mxu0 %v2878_v19 }
  0x5c   :  { %2350 = vmatprep.subr.mxu1 %v3715_v0  ;;  %644 = vmatpush1.msra.mxu0 %v2881_v20 }
  0x5d   :  { %2351 = vmatpush3.msra.mxu1 %v3036_v58  ;;  %645 = vmatprep.subr.mxu0 %v2884_v22 }
  0x5e   :  { %2352 = vmatprep.subr.mxu1 %v3715_v0  ;;  %646 = vmatpush1.msra.mxu0 %v2889_v23 }
  0x5f   :  { %2353 = vmatpush3.msra.mxu1 %v3042_v59  ;;  %647 = vmatprep.subr.mxu0 %v2895_v25 }
  0x60   :  { %2355 = vmatmul.mubr.f32.vlgmr.msra.gmra.mxu1 %v3715_v0  ;;  %2357 = vmatprep.subr.mxu1 %v3715_v0 }
  0x61   :  { %2358 = vmatpush3.msra.mxu1 %v2909_v29  ;;  %648 = vmatpush1.msra.mxu0 %v2898_v26 }
  0x62   :  { %2359 = vmatprep.subr.mxu1 %v3715_v0  ;;  %649 = vmatprep.subr.mxu0 %v2901_v27 }
  0x63   :  { %2360 = vmatpush3.msra.mxu1 %v2930_v35  ;;  %650 = vmatpush1.msra.mxu0 %v2907_v28 }
  0x64   :  { %2361 = vmatprep.subr.mxu1 %v3715_v0  ;;  %651 = vmatprep.subr.mxu0 %v2915_v31 }
  0x65   :  { %2362 = vmatpush3.msra.mxu1 %v2948_v41  ;;  %652 = vmatpush1.msra.mxu0 %v2918_v32 }
  0x66   :  { %2363 = vmatprep.subr.mxu1 %v3715_v0  ;;  %653 = vmatprep.subr.mxu0 %v2922_v33 }
  0x67   :  { %2364 = vmatpush3.msra.mxu1 %v2966_v47  ;;  %654 = vmatpush1.msra.mxu0 %v2928_v34 }
  0x68   :  { %2365 = vmatprep.subr.mxu1 %v3715_v0  ;;  %655 = vmatprep.subr.mxu0 %v2934_v37 }
  0x69   :  { %2366 = vmatpush3.msra.mxu1 %v2972_v48  ;;  %656 = vmatpush1.msra.mxu0 %v2937_v38 }
  0x6a   :  { %2367 = vmatprep.subr.mxu1 %v3715_v0  ;;  %657 = vmatprep.subr.mxu0 %v2941_v39 }
  0x6b   :  { %2368 = vmatpush3.msra.mxu1 %v2978_v49  ;;  %658 = vmatpush1.msra.mxu0 %v2946_v40 }
  0x6c   :  { %2369 = vmatprep.subr.mxu1 %v3715_v0  ;;  %659 = vmatprep.subr.mxu0 %v2952_v43 }
  0x6d   :  { %2370 = vmatpush3.msra.mxu1 %v2984_v50  ;;  %660 = vmatpush1.msra.mxu0 %v2955_v44 }
  0x6e   :  { %2371 = vmatprep.subr.mxu1 %v3715_v0  ;;  %661 = vmatprep.subr.mxu0 %v2959_v45 }
  0x6f   :  { %2372 = vmatpush3.msra.mxu1 %v2992_v51  ;;  %662 = vmatpush1.msra.mxu0 %v2964_v46 }
  0x70   :  { %2373 = vmatprep.subr.mxu1 %v3715_v0  ;;  %695 = vmatprep.mubr.f32.mxu0 %v3715_v0 }
  0x71   :  { %2374 = vmatpush3.msra.mxu1 %v2998_v52  ;;  %2389 = vmatprep.mubr.msk.f32.mxu1 %vm2787_vm1, %v3715_v0 }
  0x72   :  { %2375 = vmatprep.subr.mxu1 %v3715_v0  ;;  %849 = vmatprep.subr.mxu0 %v2832_v4  ;;  %v86_v4 = vsub.s32 2, %v77_v61 }
  0x73   :  { %2376 = vmatpush3.msra.mxu1 %v3005_v53 }
  0x74   :  { %2377 = vmatprep.subr.mxu1 %v3715_v0  ;;  %v87_v62 = vrot.slane %v60_v63, %v86_v4 }
  0x75   :  { %2378 = vmatpush3.msra.mxu1 %v3011_v54 }
  0x76   :  { %2379 = vmatprep.subr.mxu1 %v3715_v0 }
  0x77   :  { %2380 = vmatpush3.msra.mxu1 %v3018_v55 }
  0x78   :  { %2381 = vmatprep.subr.mxu1 %v3715_v0 }
  0x79   :  { %2382 = vmatpush3.msra.mxu1 %v3024_v56 }
  0x7a   :  { %2383 = vmatprep.subr.mxu1 %v3715_v0 }
  0x7b   :  { %2384 = vmatpush3.msra.mxu1 %v3030_v57 }
  0x7c   :  { %2385 = vmatprep.subr.mxu1 %v3715_v0 }
  0x7d   :  { %2386 = vmatpush3.msra.mxu1 %v3036_v58 }
  0x7e   :  { %2387 = vmatprep.subr.mxu1 %v3715_v0 }
  0x7f   :  { %2388 = vmatpush3.msra.mxu1 %v3042_v59 }
  0x80   :  { %2392 = vmatprep.subr.mxu1 %v3715_v0 }
  0xe9   :  { %v182_v1 = vpop.f32.mrf.mxu0 }
  0xeb   :  { %v184_v3 = vpop.f32.mrf.mxu0 }
  0xed   :  { %v188_v13 = vpop.f32.mrf.mxu0 }
  0xee   :  { %v3108_v21 = vadd.f32 %v188_v13, %v79_v8 }
  0xef   :  { %v190_v24 = vpop.f32.mrf.mxu0 }
  0xf0   :  { %3741 = vst [vmem:[#allocation18_spill] sm:$0xff] %v3108_v21  ;;  %v3110_v30 = vadd.f32 %v190_v24, %v83_v18 }
  0xf1   :  { %v194_v36 = vpop.f32.mrf.mxu0 }
  0xf2   :  { %3742 = vst [vmem:[#allocation19_spill] sm:$0xff] %v3110_v30  ;;  %v3112_v42 = vadd.f32 %v194_v36, %v79_v8 }
  0xf3   :  { %v196_v60 = vpop.f32.mrf.mxu0 }
  0xf4   :  { %3743 = vst [vmem:[#allocation20_spill] sm:$0xff] %v3112_v42  ;;  %v3114_v0 = vadd.f32 %v196_v60, %v83_v18  ;;  %v2312_v24 = vpop.f32.mrf.mxu1 }
  0xf5   :  { %v200_v59 = vpop.f32.mrf.mxu0  ;;  %v3124_v36 = vadd.f32 %v2312_v24, %v87_v62 }
  0xf6   :  { %3744 = vst [vmem:[#allocation21_spill] sm:$0xff] %v3114_v0  ;;  %v3116_v46 = vadd.f32 %v200_v59, %v79_v8 }
  0xf7   :  { %v202_v45 = vpop.f32.mrf.mxu0  ;;  %3749 = vst [vmem:[#allocation26_spill] sm:$0xff] %v3124_v36 }
  0xf8   :  { %3745 = vst [vmem:[#allocation22_spill] sm:$0xff] %v3116_v46  ;;  %v3118_v58 = vadd.f32 %v202_v45, %v83_v18 }
  0xf9   :  { %v206_v2 = vpop.f32.mrf.mxu0 }
  0xfa   :  { %3746 = vst [vmem:[#allocation23_spill] sm:$0xff] %v3118_v58  ;;  %v3120_v13 = vadd.f32 %v206_v2, %v79_v8  ;;  %v295_v58 = vpop.f32.mrf.mxu1 }
  0xfb   :  { %v208_v21 = vpop.f32.mrf.mxu0 }
  0xfc   :  { %3747 = vst [vmem:[#allocation24_spill] sm:$0xff] %v3120_v13  ;;  %v3122_v30 = vadd.f32 %v208_v21, %v83_v18  ;;  %v183_v21 = vadd.f32 %v182_v1, %v79_v8  ;;  %v185_v1 = vadd.f32 %v184_v3, %v83_v18 }
  0xfd   :  { %v212_v42 = vpop.f32.mrf.mxu0 }
  0xfe   :  { %3748 = vst [vmem:[#allocation25_spill] sm:$0xff] %v3122_v30  ;;  %v3126_v60 = vadd.f32 %v212_v42, %v79_v8 }
  0xff   :  { %v214_v61 = vpop.f32.mrf.mxu0 }
 0x100   :  { %3750 = vst [vmem:[#allocation27_spill] sm:$0xff] %v3126_v60  ;;  %v3128_v0 = vadd.f32 %v214_v61, %v83_v18 }
 0x101   :  { %v218_v59 = vpop.f32.mrf.mxu0 }
 0x102   :  { %3751 = vst [vmem:[#allocation28_spill] sm:$0xff] %v3128_v0  ;;  %v3130_v46 = vadd.f32 %v218_v59, %v79_v8 }
 0x103   :  { %v220_v45 = vpop.f32.mrf.mxu0 }
 0x104   :  { %3752 = vst [vmem:[#allocation29_spill] sm:$0xff] %v3130_v46  ;;  %v3132_v4 = vadd.f32 %v220_v45, %v83_v18 }
 0x105   :  { %v224_v63 = vpop.f32.mrf.mxu0 }
 0x106   :  { %3753 = vst [vmem:[#allocation30_spill] sm:$0xff] %v3132_v4  ;;  %v3134_v2 = vadd.f32 %v224_v63, %v79_v8 }
 0x107   :  { %v226_v13 = vpop.f32.mrf.mxu0 }
 0x108   :  { %3754 = vst [vmem:[#allocation31_spill] sm:$0xff] %v3134_v2  ;;  %v3136_v30 = vadd.f32 %v226_v13, %v83_v18 }
 0x109   :  { %v475_v24 = vpop.f32.mrf.mxu0 }
 0x10a   :  { %3755 = vst [vmem:[#allocation32_spill] sm:$0xff] %v3136_v30  ;;  %v550_v42 = vadd.f32 %v475_v24, %v183_v21  ;;  %v2315_v60 = vpop.f32.mrf.mxu1 }
 0x10b   :  { %v3138_v61 = vadd.f32 %v2315_v60, %v87_v62  ;;  %v477_v2 = vpop.f32.mrf.mxu0 }
 0x10c   :  { %v2146_v36 = vmul.f32 -1.442695, %v550_v42  ;;  %v305_v0 = vpop.f32.mrf.mxu1  ;;  %v557_v21 = vadd.f32 %v477_v2, %v185_v1  ;;  %v296_v2 = vadd.f32 %v295_v58, %v87_v62  ;;  %v3760_v58 = vmov 0.0  }
 0x10d   :  { %v3140_v59 = vadd.f32 %v305_v0, %v87_v62 }
 0x10e   :  { %2612 = vpow2.f32 %v2146_v36  ;;  %v2318_v45 = vpop.f32.mrf.mxu1  ;;  %v2147_v60 = vmul.f32 -1.442695, %v557_v21 }
 0x10f   :  { %v3142_v4 = vadd.f32 %v2318_v45, %v87_v62 }
 0x110   :  { %v315_v63 = vpop.f32.mrf.mxu1  ;;  %2614 = vpow2.f32 %v2147_v60 }
 0x111   :  { %3756 = vst [vmem:[#allocation33_spill] sm:$0xff] %v3142_v4  ;;  %v3144_v46 = vadd.f32 %v315_v63, %v87_v62  ;;  %v3153_v63 = vld [vmem:[%s3713_s4] ss:$0 sm:$0xff] }
 0x112   :  { %v2321_v8 = vpop.f32.mrf.mxu1 }
 0x113   :  { %3757 = vst [vmem:[#allocation34_spill] sm:$0xff] %v3144_v46  ;;  %v3146_v13 = vadd.f32 %v2321_v8, %v87_v62 }
 0x114   :  { %v325_v24 = vpop.f32.mrf.mxu1 }
 0x115   :  { %3758 = vst [vmem:[#allocation35_spill] sm:$0xff] %v3146_v13  ;;  %v3148_v42 = vadd.f32 %v325_v24, %v87_v62 }
 0x117   :  { %3759 = vst [vmem:[#allocation36_spill] sm:$0xff] %v3148_v42 }
 0x11b   :  { %v2613_v30 = vpop.eup %2612 }
 0x11c   :  { %v554_v36 = vadd.f32 1.0, %v2613_v30 }
 0x11d   :  { %v2615_v18 = vpop.eup %2614 }
 0x11e   :  { %2616 = vrcp.f32 %v554_v36  ;;  %v561_v24 = vadd.f32 1.0, %v2615_v18 }
 0x120   :  { %v546_v0 = vpop.f32.mrf.mxu1 }
 0x121   :  { %v570_v3 = vadd.f32 %v3153_v63, %v546_v0 }
 0x122   :  { %v2356_v45 = vpop.f32.mrf.mxu1 }
 0x12b   :  { %v2617_v8 = vpop.eup %2616 }
 0x12c   :  { %v571_v1 = vmul.f32 %v2617_v8, %v570_v3  ;;  %v3768_v8 = vld [vmem:[#allocation26_spill] sm:$0xff] }
 0x12e   :  { %v572_v13 = vadd.f32 %v571_v1, %v296_v2 }
 0x130   :  { %2618 = vtanh.f32 %v572_v13 }
 0x131   :  { %2620 = vrcp.f32 %v561_v24 }
 0x13d   :  { %v2619_v30 = vpop.eup %2618 }
 0x13e   :  { %v574_v21 = vsub.f32 0.0, %v2619_v30  ;;  %v2621_v60 = vpop.eup %2620 }
 0x140   :  { %v575_v36 = vmul.f32 %v2621_v60, %v574_v21 }
 0x142   :  { %v3156_v45 = vadd.f32 %v2619_v30, %v575_v36 }
 0x144   :  { %578 = vst [vmem:[#allocation9] sm:$0xff] %v3156_v45  ;;  %696 = vmatmul.mubr.f32.vlgmr.msra.gmra.mxu0 %v3156_v45  ;;  %2390 = vmatmul.mubr.f32.vlgmr.msra.gmra.mxu1 %v3156_v45 }
 0x145   :  { %850 = vmatpush1.msra.mxu0 %v2834_v5  ;;  %2393 = vmatpush3.msra.mxu1 %v2909_v29 }
 0x146   :  { %851 = vmatprep.subr.mxu0 %v2837_v6  ;;  %2394 = vmatprep.subr.mxu1 %v3760_v58 }
 0x147   :  { %852 = vmatpush1.msra.mxu0 %v2841_v7  ;;  %2395 = vmatpush3.msra.mxu1 %v2930_v35 }
 0x148   :  { %853 = vmatprep.subr.mxu0 %v2845_v9  ;;  %2396 = vmatprep.subr.mxu1 %v3760_v58 }
 0x149   :  { %854 = vmatpush1.msra.mxu0 %v2848_v10  ;;  %2397 = vmatpush3.msra.mxu1 %v2948_v41 }
 0x14a   :  { %855 = vmatprep.subr.mxu0 %v2851_v11  ;;  %2398 = vmatprep.subr.mxu1 %v3760_v58 }
 0x14b   :  { %856 = vmatpush1.msra.mxu0 %v2855_v12  ;;  %2399 = vmatpush3.msra.mxu1 %v2966_v47 }
 0x14c   :  { %857 = vmatprep.subr.mxu0 %v2861_v14  ;;  %2400 = vmatprep.subr.mxu1 %v3760_v58 }
 0x14d   :  { %858 = vmatpush1.msra.mxu0 %v2864_v15  ;;  %2401 = vmatpush3.msra.mxu1 %v2972_v48 }
 0x14e   :  { %859 = vmatprep.subr.mxu0 %v2867_v16  ;;  %2402 = vmatprep.subr.mxu1 %v3760_v58 }
 0x14f   :  { %860 = vmatpush1.msra.mxu0 %v2872_v17  ;;  %2403 = vmatpush3.msra.mxu1 %v2978_v49 }
 0x150   :  { %861 = vmatprep.subr.mxu0 %v2878_v19  ;;  %2404 = vmatprep.subr.mxu1 %v3760_v58 }
 0x151   :  { %862 = vmatpush1.msra.mxu0 %v2881_v20  ;;  %2405 = vmatpush3.msra.mxu1 %v2984_v50 }
 0x152   :  { %863 = vmatprep.subr.mxu0 %v2884_v22  ;;  %2406 = vmatprep.subr.mxu1 %v3760_v58  ;;  %v3761_v22 = vld [vmem:[#allocation16_spill] sm:$0xff] }
 0x153   :  { %864 = vmatpush1.msra.mxu0 %v2889_v23  ;;  %2407 = vmatpush3.msra.mxu1 %v2992_v51  ;;  %v3762_v23 = vld [vmem:[#allocation14_spill] sm:$0xff] }
 0x154   :  { %865 = vmatprep.subr.mxu0 %v2895_v25  ;;  %2408 = vmatprep.subr.mxu1 %v3760_v58  ;;  %v3763_v25 = vld [vmem:[#allocation15_spill] sm:$0xff] }
 0x155   :  { %866 = vmatpush1.msra.mxu0 %v2898_v26  ;;  %2409 = vmatpush3.msra.mxu1 %v2998_v52  ;;  %v3764_v26 = vld [vmem:[#allocation17_spill] sm:$0xff] }
 0x156   :  { %867 = vmatprep.subr.mxu0 %v2901_v27  ;;  %2410 = vmatprep.subr.mxu1 %v3760_v58  ;;  %v3765_v27 = vld [vmem:[#allocation13_spill] sm:$0xff] }
 0x157   :  { %868 = vmatpush1.msra.mxu0 %v2907_v28  ;;  %2411 = vmatpush3.msra.mxu1 %v3005_v53 }
 0x158   :  { %869 = vmatprep.subr.mxu0 %v2915_v31  ;;  %2412 = vmatprep.subr.mxu1 %v3760_v58 }
 0x159   :  { %870 = vmatpush1.msra.mxu0 %v2918_v32  ;;  %2413 = vmatpush3.msra.mxu1 %v3011_v54  ;;  %v3766_v32 = vld [vmem:[#allocation18_spill] sm:$0xff] }
 0x15a   :  { %871 = vmatprep.subr.mxu0 %v2922_v33  ;;  %2414 = vmatprep.subr.mxu1 %v3760_v58 }
 0x15b   :  { %872 = vmatpush1.msra.mxu0 %v2928_v34  ;;  %2415 = vmatpush3.msra.mxu1 %v3018_v55 }
 0x15c   :  { %873 = vmatprep.subr.mxu0 %v2934_v37  ;;  %2416 = vmatprep.subr.mxu1 %v3760_v58 }
 0x15d   :  { %874 = vmatpush1.msra.mxu0 %v2937_v38  ;;  %2417 = vmatpush3.msra.mxu1 %v3024_v56 }
 0x15e   :  { %875 = vmatprep.subr.mxu0 %v2941_v39  ;;  %2418 = vmatprep.subr.mxu1 %v3760_v58  ;;  %v3767_v39 = vld [vmem:[#allocation19_spill] sm:$0xff] }
 0x15f   :  { %876 = vmatpush1.msra.mxu0 %v2946_v40  ;;  %2419 = vmatpush3.msra.mxu1 %v3030_v57 }
 0x160   :  { %877 = vmatprep.subr.mxu0 %v2952_v43  ;;  %2420 = vmatprep.subr.mxu1 %v3760_v58 }
 0x161   :  { %878 = vmatpush1.msra.mxu0 %v2955_v44  ;;  %2421 = vmatpush3.msra.mxu1 %v3761_v22 }
 0x162   :  { %879 = vmatprep.subr.mxu0 %v3762_v23  ;;  %2422 = vmatprep.subr.mxu1 %v3760_v58 }
 0x163   :  { %880 = vmatpush1.msra.mxu0 %v3763_v25  ;;  %913 = vmatprep.mubr.f32.mxu0 %v3760_v58 }
 0x164   :  { %2423 = vmatpush3.msra.mxu1 %v3764_v26  ;;  %2424 = vmatprep.mubr.msk.f32.mxu1 %vm2787_vm1, %v3760_v58 }
 0x165   :  { %1067 = vmatprep.subr.mxu0 %v3765_v27  ;;  %2427 = vmatprep.subr.mxu1 %v3760_v58 }
 0x204   :  { %v697_v28 = vpop.f32.mrf.mxu0  ;;  %v768_v31 = vpop.f32.mrf.mxu1 }
 0x205   :  { %v772_v33 = vadd.f32 %v697_v28, %v3766_v32  ;;  %v786_v0 = vadd.f32 %v3153_v63, %v768_v31 }
 0x206   :  { %v2391_v34 = vpop.f32.mrf.mxu1  ;;  %v699_v38 = vpop.f32.mrf.mxu0 }
 0x207   :  { %v2149_v37 = vmul.f32 -1.442695, %v772_v33  ;;  %v779_v40 = vadd.f32 %v699_v38, %v3767_v39 }
 0x209   :  { %2622 = vpow2.f32 %v2149_v37  ;;  %v2150_v43 = vmul.f32 -1.442695, %v779_v40  ;;  %v3356_v40 = vld [vmem:[#allocation8 + $0x168] sm:$0xff] }
 0x20b   :  { %2624 = vpow2.f32 %v2150_v43  ;;  %v3358_v43 = vld [vmem:[#allocation8 + $0x178] sm:$0xff] }
 0x216   :  { %v2623_v44 = vpop.eup %2622 }
 0x217   :  { %v776_v62 = vadd.f32 1.0, %v2623_v44  ;;  %v3362_v44 = vld [vmem:[#allocation8 + $0x158] sm:$0xff] }
 0x218   :  { %v2625_v13 = vpop.eup %2624 }
 0x219   :  { %2626 = vrcp.f32 %v776_v62  ;;  %v783_v1 = vadd.f32 1.0, %v2625_v13  ;;  %v3366_v62 = vld [vmem:[#allocation8 + $0x150] sm:$0xff]  ;;  %v3368_v13 = vld [vmem:[#allocation8 + $0x160] sm:$0xff] }
 0x226   :  { %v2627_v3 = vpop.eup %2626 }
 0x227   :  { %v787_v18 = vmul.f32 %v2627_v3, %v786_v0  ;;  %v3372_v0 = vld [vmem:[#allocation8 + $0x140] sm:$0xff]  ;;  %v3376_v3 = vld [vmem:[#allocation8 + $0x138] sm:$0xff] }
 0x229   :  { %v788_v2 = vadd.f32 %v787_v18, %v3768_v8  ;;  %v3378_v18 = vld [vmem:[#allocation8 + $0x148] sm:$0xff] }
 0x22a   :  { %v3382_v8 = vld [vmem:[#allocation8 + $0x128] sm:$0xff] }
 0x22b   :  { %2628 = vtanh.f32 %v788_v2  ;;  %v3386_v2 = vld [vmem:[#allocation8 + $0x120] sm:$0xff] }
 0x22c   :  { %2630 = vrcp.f32 %v783_v1  ;;  %v3388_v1 = vld [vmem:[#allocation8 + $0x130] sm:$0xff] }
 0x238   :  { %v2629_v24 = vpop.eup %2628 }
 0x239   :  { %v790_v30 = vsub.f32 %v3156_v45, %v2629_v24  ;;  %v2631_v21 = vpop.eup %2630 }
 0x23b   :  { %v791_v60 = vmul.f32 %v2631_v21, %v790_v30  ;;  %v3396_v30 = vld [vmem:[#allocation8 + $0x108] sm:$0xff]  ;;  %v3398_v21 = vld [vmem:[#allocation8 + $0x118] sm:$0xff] }
 0x23d   :  { %v3233_v36 = vadd.f32 %v2629_v24, %v791_v60  ;;  %v3392_v24 = vld [vmem:[#allocation8 + $0x110] sm:$0xff]  ;;  %v3402_v60 = vld [vmem:[#allocation8 + $0xf8] sm:$0xff] }
 0x23f   :  { %796 = vst [vmem:[#allocation9 + $0x8] sm:$0xff] %v3233_v36  ;;  %914 = vmatmul.mubr.f32.vlgmr.msra.gmra.mxu0 %v3233_v36  ;;  %2425 = vmatmul.mubr.f32.vlgmr.msra.gmra.mxu1 %v3233_v36 }
 0x240   :  { %1068 = vmatpush1.msra.mxu0 %v2834_v5  ;;  %2428 = vmatpush3.msra.mxu1 %v2909_v29  ;;  %v3286_v5 = vld [vmem:[#allocation8 + $0xc8] sm:$0xff]  ;;  %v3323_v29 = vld [vmem:[#allocation8 + $0x30] sm:$0xff] }
 0x241   :  { %1069 = vmatprep.subr.mxu0 %v2837_v6  ;;  %2429 = vmatprep.subr.mxu1 %v3760_v58  ;;  %v3288_v6 = vld [vmem:[#allocation8 + $0xc0] sm:$0xff] }
 0x242   :  { %1070 = vmatpush1.msra.mxu0 %v2841_v7  ;;  %2430 = vmatpush3.msra.mxu1 %v2930_v35  ;;  %v3290_v7 = vld [vmem:[#allocation8 + $0xb0] sm:$0xff]  ;;  %v3326_v35 = vld [vmem:[#allocation8 + $0x20] sm:$0xff] }
 0x243   :  { %1071 = vmatprep.subr.mxu0 %v2845_v9  ;;  %2431 = vmatprep.subr.mxu1 %v3760_v58  ;;  %v3293_v9 = vld [vmem:[#allocation8 + $0xa8] sm:$0xff] }
 0x244   :  { %1072 = vmatpush1.msra.mxu0 %v2848_v10  ;;  %2432 = vmatpush3.msra.mxu1 %v2948_v41  ;;  %v3296_v10 = vld [vmem:[#allocation8 + $0x98] sm:$0xff] }
 0x245   :  { %1073 = vmatprep.subr.mxu0 %v2851_v11  ;;  %2433 = vmatprep.subr.mxu1 %v3760_v58  ;;  %v3299_v11 = vld [vmem:[#allocation8 + $0x90] sm:$0xff]  ;;  %v3329_v41 = vld [vmem:[#allocation8 + $0x18] sm:$0xff] }
 0x246   :  { %1074 = vmatpush1.msra.mxu0 %v2855_v12  ;;  %2434 = vmatpush3.msra.mxu1 %v2966_v47  ;;  %v3302_v12 = vld [vmem:[#allocation8 + $0x80] sm:$0xff]  ;;  %3769 = vst [vmem:[#allocation16_spill] sm:$0xff] %v3329_v41  ;;  %v3332_v47 = vld [vmem:[#allocation8 + $0x8] sm:$0xff] }
 0x247   :  { %1075 = vmatprep.subr.mxu0 %v2861_v14  ;;  %2435 = vmatprep.subr.mxu1 %v3760_v58  ;;  %v3305_v14 = vld [vmem:[#allocation8 + $0x78] sm:$0xff]  ;;  %3770 = vst [vmem:[#allocation14_spill] sm:$0xff] %v3332_v47 }
 0x248   :  { %1076 = vmatpush1.msra.mxu0 %v2864_v15  ;;  %2436 = vmatpush3.msra.mxu1 %v2972_v48  ;;  %v3308_v15 = vld [vmem:[#allocation8 + $0x68] sm:$0xff]  ;;  %v3335_v48 = vld [vmem:[#allocation8] sm:$0xff] }
 0x249   :  { %1077 = vmatprep.subr.mxu0 %v2867_v16  ;;  %2437 = vmatprep.subr.mxu1 %v3760_v58  ;;  %v3311_v16 = vld [vmem:[#allocation8 + $0x60] sm:$0xff]  ;;  %3771 = vst [vmem:[#allocation15_spill] sm:$0xff] %v3335_v48 }
 0x24a   :  { %1078 = vmatpush1.msra.mxu0 %v2872_v17  ;;  %2438 = vmatpush3.msra.mxu1 %v2978_v49  ;;  %v3314_v17 = vld [vmem:[#allocation8 + $0x50] sm:$0xff] }
 0x24b   :  { %1079 = vmatprep.subr.mxu0 %v2878_v19  ;;  %2439 = vmatprep.subr.mxu1 %v3760_v58  ;;  %v3317_v19 = vld [vmem:[#allocation8 + $0x48] sm:$0xff] }
 0x24c   :  { %1080 = vmatpush1.msra.mxu0 %v2881_v20  ;;  %2440 = vmatpush3.msra.mxu1 %v2984_v50  ;;  %v3320_v20 = vld [vmem:[#allocation8 + $0x38] sm:$0xff] }
 0x24d   :  { %2441 = vmatprep.subr.mxu1 %v3760_v58  ;;  %1131 = vmatprep.mubr.f32.mxu0 %v3760_v58 }
 0x24e   :  { %2442 = vmatpush3.msra.mxu1 %v2992_v51  ;;  %2459 = vmatprep.mubr.msk.f32.mxu1 %vm2787_vm1, %v3760_v58  ;;  %v3772_v51 = vld [vmem:[#allocation20_spill] sm:$0xff] }
 0x24f   :  { %2443 = vmatprep.subr.mxu1 %v3760_v58  ;;  %1081 = vmatprep.subr.mxu0 %v3286_v5 }
 0x250   :  { %2444 = vmatpush3.msra.mxu1 %v2998_v52  ;;  %1082 = vmatpush1.msra.mxu0 %v3288_v6 }
 0x251   :  { %2445 = vmatprep.subr.mxu1 %v3760_v58  ;;  %1083 = vmatprep.subr.mxu0 %v3290_v7 }
 0x252   :  { %2446 = vmatpush3.msra.mxu1 %v3005_v53  ;;  %1084 = vmatpush1.msra.mxu0 %v3293_v9 }
 0x253   :  { %2447 = vmatprep.subr.mxu1 %v3760_v58  ;;  %1085 = vmatprep.subr.mxu0 %v3296_v10 }
 0x254   :  { %2448 = vmatpush3.msra.mxu1 %v3011_v54  ;;  %1086 = vmatpush1.msra.mxu0 %v3299_v11 }
 0x255   :  { %2449 = vmatprep.subr.mxu1 %v3760_v58  ;;  %1087 = vmatprep.subr.mxu0 %v3302_v12 }
 0x256   :  { %2450 = vmatpush3.msra.mxu1 %v3018_v55  ;;  %1088 = vmatpush1.msra.mxu0 %v3305_v14 }
 0x257   :  { %2451 = vmatprep.subr.mxu1 %v3760_v58  ;;  %1089 = vmatprep.subr.mxu0 %v3308_v15 }
 0x258   :  { %2452 = vmatpush3.msra.mxu1 %v3024_v56  ;;  %1090 = vmatpush1.msra.mxu0 %v3311_v16  ;;  %v3773_v56 = vld [vmem:[#allocation21_spill] sm:$0xff] }
 0x259   :  { %2453 = vmatprep.subr.mxu1 %v3760_v58  ;;  %1091 = vmatprep.subr.mxu0 %v3314_v17 }
 0x25a   :  { %2454 = vmatpush3.msra.mxu1 %v3030_v57  ;;  %1092 = vmatpush1.msra.mxu0 %v3317_v19 }
 0x25b   :  { %2455 = vmatprep.subr.mxu1 %v3760_v58  ;;  %1093 = vmatprep.subr.mxu0 %v3320_v20 }
 0x25c   :  { %2456 = vmatpush3.msra.mxu1 %v3761_v22  ;;  %1094 = vmatpush1.msra.mxu0 %v3323_v29 }
 0x25d   :  { %2457 = vmatprep.subr.mxu1 %v3760_v58  ;;  %1095 = vmatprep.subr.mxu0 %v3326_v35 }
 0x25e   :  { %2458 = vmatpush3.msra.mxu1 %v3764_v26  ;;  %1096 = vmatpush1.msra.mxu0 %v3329_v41 }
 0x25f   :  { %2462 = vmatprep.subr.mxu1 %v3760_v58  ;;  %1097 = vmatprep.subr.mxu0 %v3332_v47 }
 0x260   :  { %1098 = vmatpush1.msra.mxu0 %v3335_v48 }
 0x2ff   :  { %v915_v49 = vpop.f32.mrf.mxu0  ;;  %v986_v50 = vpop.f32.mrf.mxu1 }
 0x300   :  { %v990_v52 = vadd.f32 %v915_v49, %v3772_v51  ;;  %v1004_v26 = vadd.f32 %v3153_v63, %v986_v50  ;;  %v3408_v49 = vld [vmem:[#allocation8 + $0x100] sm:$0xff]  ;;  %v3416_v51 = vld [vmem:[#allocation8 + $0xd8] sm:$0xff] }
 0x301   :  { %v2426_v53 = vpop.f32.mrf.mxu1  ;;  %v917_v55 = vpop.f32.mrf.mxu0  ;;  %v3412_v50 = vld [vmem:[#allocation8 + $0xe0] sm:$0xff] }
 0x302   :  { %v2151_v54 = vmul.f32 -1.442695, %v990_v52  ;;  %v997_v57 = vadd.f32 %v917_v55, %v3773_v56  ;;  %v3418_v52 = vld [vmem:[#allocation8 + $0xe8] sm:$0xff]  ;;  %v3420_v53 = vld [vmem:[#allocation8 + $0xd0] sm:$0xff]  ;;  %v3432_v55 = vld [vmem:[#allocation8 + $0xa0] sm:$0xff] }
 0x303   :  { %v3438_v56 = vld [vmem:[#allocation8 + $0x88] sm:$0xff] }
 0x304   :  { %2632 = vpow2.f32 %v2151_v54  ;;  %v2152_v45 = vmul.f32 -1.442695, %v997_v57  ;;  %v3426_v54 = vld [vmem:[#allocation8 + $0xb8] sm:$0xff]  ;;  %v3444_v57 = vld [vmem:[#allocation8 + $0x70] sm:$0xff] }
 0x306   :  { %2634 = vpow2.f32 %v2152_v45  ;;  %v3450_v45 = vld [vmem:[#allocation8 + $0x58] sm:$0xff] }
 0x311   :  { %v2633_v22 = vpop.eup %2632 }
 0x312   :  { %v994_v23 = vadd.f32 1.0, %v2633_v22  ;;  %v3456_v22 = vld [vmem:[#allocation8 + $0x40] sm:$0xff] }
 0x313   :  { %v2635_v25 = vpop.eup %2634 }
 0x314   :  { %2636 = vrcp.f32 %v994_v23  ;;  %v1001_v32 = vadd.f32 1.0, %v2635_v25  ;;  %v3462_v23 = vld [vmem:[#allocation8 + $0x28] sm:$0xff]  ;;  %v3468_v25 = vld [vmem:[#allocation8 + $0x10] sm:$0xff] }
 0x315   :  { %3775 = vst [vmem:[#allocation13_spill] sm:$0xff] %v3462_v23  ;;  %3776 = vst [vmem:[#allocation18_spill] sm:$0xff] %v3468_v25 }
 0x321   :  { %v2637_v27 = vpop.eup %2636 }
 0x322   :  { %v1005_v28 = vmul.f32 %v2637_v27, %v1004_v26 }
 0x324   :  { %v1006_v31 = vadd.f32 %v1005_v28, %v3140_v59  ;;  %v3353_v59 = vld [vmem:[#allocation8 + $0x170] sm:$0xff]  ;;  %v3777_v28 = vld [vmem:[#allocation22_spill] sm:$0xff] }
 0x325   :  { %3774 = vst [vmem:[#allocation17_spill] sm:$0xff] %v3353_v59  ;;  %1285 = vmatprep.subr.mxu0 %v3353_v59 }
 0x326   :  { %2638 = vtanh.f32 %v1006_v31 }
 0x327   :  { %2640 = vrcp.f32 %v1001_v32 }
 0x333   :  { %v2639_v33 = vpop.eup %2638 }
 0x334   :  { %v1008_v34 = vsub.f32 %v3233_v36, %v2639_v33  ;;  %v2641_v37 = vpop.eup %2640  ;;  %v3406_v36 = vld [vmem:[#allocation8 + $0xf0] sm:$0xff] }
 0x336   :  { %v1009_v38 = vmul.f32 %v2641_v37, %v1008_v34  ;;  %v3778_v37 = vld [vmem:[#allocation23_spill] sm:$0xff] }
 0x338   :  { %v3345_v39 = vadd.f32 %v2639_v33, %v1009_v38 }
 0x33a   :  { %1014 = vst [vmem:[#allocation9 + $0x10] sm:$0xff] %v3345_v39  ;;  %1132 = vmatmul.mubr.f32.vlgmr.msra.gmra.mxu0 %v3345_v39  ;;  %2460 = vmatmul.mubr.f32.vlgmr.msra.gmra.mxu1 %v3345_v39 }
 0x33b   :  { %1349 = vmatprep.mubr.f32.mxu0 %v3760_v58  ;;  %2494 = vmatprep.mubr.msk.f32.mxu1 %vm2787_vm1, %v3760_v58 }
 0x33c   :  { %1286 = vmatpush1.msra.mxu0 %v3356_v40  ;;  %2463 = vmatpush3.msra.mxu1 %v3358_v43 }
 0x33d   :  { %1287 = vmatprep.subr.mxu0 %v3362_v44  ;;  %2464 = vmatprep.subr.mxu1 %v3760_v58 }
 0x33e   :  { %1288 = vmatpush1.msra.mxu0 %v3366_v62  ;;  %2465 = vmatpush3.msra.mxu1 %v3368_v13 }
 0x33f   :  { %1289 = vmatprep.subr.mxu0 %v3372_v0  ;;  %2466 = vmatprep.subr.mxu1 %v3760_v58 }
 0x340   :  { %1290 = vmatpush1.msra.mxu0 %v3376_v3  ;;  %2467 = vmatpush3.msra.mxu1 %v3378_v18 }
 0x341   :  { %1291 = vmatprep.subr.mxu0 %v3382_v8  ;;  %2468 = vmatprep.subr.mxu1 %v3760_v58 }
 0x342   :  { %1292 = vmatpush1.msra.mxu0 %v3386_v2  ;;  %2469 = vmatpush3.msra.mxu1 %v3388_v1 }
 0x343   :  { %1293 = vmatprep.subr.mxu0 %v3392_v24  ;;  %2470 = vmatprep.subr.mxu1 %v3760_v58 }
 0x344   :  { %1294 = vmatpush1.msra.mxu0 %v3396_v30  ;;  %2471 = vmatpush3.msra.mxu1 %v3398_v21 }
 0x345   :  { %1295 = vmatprep.subr.mxu0 %v3402_v60  ;;  %2472 = vmatprep.subr.mxu1 %v3760_v58 }
 0x346   :  { %1296 = vmatpush1.msra.mxu0 %v3406_v36  ;;  %2473 = vmatpush3.msra.mxu1 %v3408_v49 }
 0x347   :  { %1297 = vmatprep.subr.mxu0 %v3412_v50  ;;  %2474 = vmatprep.subr.mxu1 %v3760_v58 }
 0x348   :  { %1298 = vmatpush1.msra.mxu0 %v3416_v51  ;;  %2475 = vmatpush3.msra.mxu1 %v3418_v52 }
 0x349   :  { %1299 = vmatprep.subr.mxu0 %v3286_v5  ;;  %2476 = vmatprep.subr.mxu1 %v3760_v58 }
 0x34a   :  { %1300 = vmatpush1.msra.mxu0 %v3288_v6  ;;  %2477 = vmatpush3.msra.mxu1 %v3420_v53 }
 0x34b   :  { %1301 = vmatprep.subr.mxu0 %v3290_v7  ;;  %2478 = vmatprep.subr.mxu1 %v3760_v58 }
 0x34c   :  { %1302 = vmatpush1.msra.mxu0 %v3293_v9  ;;  %2479 = vmatpush3.msra.mxu1 %v3426_v54 }
 0x34d   :  { %1303 = vmatprep.subr.mxu0 %v3296_v10  ;;  %2480 = vmatprep.subr.mxu1 %v3760_v58 }
 0x34e   :  { %1304 = vmatpush1.msra.mxu0 %v3299_v11  ;;  %2481 = vmatpush3.msra.mxu1 %v3432_v55 }
 0x34f   :  { %1305 = vmatprep.subr.mxu0 %v3302_v12  ;;  %2482 = vmatprep.subr.mxu1 %v3760_v58 }
 0x350   :  { %1306 = vmatpush1.msra.mxu0 %v3305_v14  ;;  %2483 = vmatpush3.msra.mxu1 %v3438_v56 }
 0x351   :  { %1307 = vmatprep.subr.mxu0 %v3308_v15  ;;  %2484 = vmatprep.subr.mxu1 %v3760_v58 }
 0x352   :  { %1308 = vmatpush1.msra.mxu0 %v3311_v16  ;;  %2485 = vmatpush3.msra.mxu1 %v3444_v57 }
 0x353   :  { %1309 = vmatprep.subr.mxu0 %v3314_v17  ;;  %2486 = vmatprep.subr.mxu1 %v3760_v58 }
 0x354   :  { %1310 = vmatpush1.msra.mxu0 %v3317_v19  ;;  %2487 = vmatpush3.msra.mxu1 %v3450_v45 }
 0x355   :  { %1311 = vmatprep.subr.mxu0 %v3320_v20  ;;  %2488 = vmatprep.subr.mxu1 %v3760_v58 }
 0x356   :  { %1312 = vmatpush1.msra.mxu0 %v3323_v29  ;;  %2489 = vmatpush3.msra.mxu1 %v3456_v22 }
 0x357   :  { %1313 = vmatprep.subr.mxu0 %v3326_v35  ;;  %2490 = vmatprep.subr.mxu1 %v3760_v58 }
 0x358   :  { %1314 = vmatpush1.msra.mxu0 %v3329_v41  ;;  %2491 = vmatpush3.msra.mxu1 %v3462_v23 }
 0x359   :  { %1315 = vmatprep.subr.mxu0 %v3332_v47  ;;  %2492 = vmatprep.subr.mxu1 %v3760_v58 }
 0x35a   :  { %1316 = vmatpush1.msra.mxu0 %v3335_v48  ;;  %2493 = vmatpush3.msra.mxu1 %v3468_v25 }
 0x35b   :  { %1503 = vmatprep.subr.mxu0 %v3353_v59  ;;  %2497 = vmatprep.subr.mxu1 %v3760_v58 }
 0x3fa   :  { %v1133_v26 = vpop.f32.mrf.mxu0  ;;  %v1204_v27 = vpop.f32.mrf.mxu1 }
 0x3fb   :  { %v1208_v31 = vadd.f32 %v1133_v26, %v3777_v28  ;;  %v1222_v59 = vadd.f32 %v3153_v63, %v1204_v27 }
 0x3fc   :  { %v2461_v32 = vpop.f32.mrf.mxu1  ;;  %v1135_v34 = vpop.f32.mrf.mxu0 }
 0x3fd   :  { %v2153_v33 = vmul.f32 -1.442695, %v1208_v31  ;;  %v1215_v38 = vadd.f32 %v1135_v34, %v3778_v37  ;;  %v3786_v37 = vld [vmem:[#allocation25_spill] sm:$0xff] }
 0x3ff   :  { %2642 = vpow2.f32 %v2153_v33  ;;  %v2154_v42 = vmul.f32 -1.442695, %v1215_v38 }
 0x401   :  { %2644 = vpow2.f32 %v2154_v42  ;;  %v3782_v42 = vld [vmem:[#allocation15_spill] sm:$0xff] }
 0x40c   :  { %v2643_v4 = vpop.eup %2642 }
 0x40d   :  { %v1212_v46 = vadd.f32 1.0, %v2643_v4  ;;  %v3780_v4 = vld [vmem:[#allocation13_spill] sm:$0xff] }
 0x40e   :  { %v2645_v25 = vpop.eup %2644 }
 0x40f   :  { %2646 = vrcp.f32 %v1212_v46  ;;  %v1219_v41 = vadd.f32 1.0, %v2645_v25  ;;  %v3779_v46 = vld [vmem:[#allocation16_spill] sm:$0xff] }
 0x41c   :  { %v2647_v48 = vpop.eup %2646 }
 0x41d   :  { %v1223_v47 = vmul.f32 %v2647_v48, %v1222_v59  ;;  %v3785_v59 = vld [vmem:[#allocation24_spill] sm:$0xff] }
 0x41f   :  { %v1224_v23 = vadd.f32 %v1223_v47, %v3138_v61  ;;  %v3781_v61 = vld [vmem:[#allocation14_spill] sm:$0xff]  ;;  %v3784_v47 = vld [vmem:[#allocation17_spill] sm:$0xff] }
 0x421   :  { %2648 = vtanh.f32 %v1224_v23 }
 0x422   :  { %2650 = vrcp.f32 %v1219_v41  ;;  %v3783_v41 = vld [vmem:[#allocation18_spill] sm:$0xff] }
 0x42e   :  { %v2649_v26 = vpop.eup %2648 }
 0x42f   :  { %v1226_v28 = vsub.f32 %v3345_v39, %v2649_v26  ;;  %v2651_v31 = vpop.eup %2650 }
 0x431   :  { %v1227_v32 = vmul.f32 %v2651_v31, %v1226_v28 }
 0x433   :  { %v3483_v33 = vadd.f32 %v2649_v26, %v1227_v32 }
 0x435   :  { %1232 = vst [vmem:[#allocation9 + $0x18] sm:$0xff] %v3483_v33  ;;  %1350 = vmatmul.mubr.f32.vlgmr.msra.gmra.mxu0 %v3483_v33  ;;  %2495 = vmatmul.mubr.f32.vlgmr.msra.gmra.mxu1 %v3483_v33 }
 0x436   :  { %1504 = vmatpush1.msra.mxu0 %v3356_v40  ;;  %2498 = vmatpush3.msra.mxu1 %v3358_v43 }
 0x437   :  { %1505 = vmatprep.subr.mxu0 %v3362_v44  ;;  %2499 = vmatprep.subr.mxu1 %v3760_v58 }
 0x438   :  { %1506 = vmatpush1.msra.mxu0 %v3366_v62  ;;  %2500 = vmatpush3.msra.mxu1 %v3368_v13 }
 0x439   :  { %1507 = vmatprep.subr.mxu0 %v3372_v0  ;;  %2501 = vmatprep.subr.mxu1 %v3760_v58 }
 0x43a   :  { %1508 = vmatpush1.msra.mxu0 %v3376_v3  ;;  %2502 = vmatpush3.msra.mxu1 %v3378_v18 }
 0x43b   :  { %1509 = vmatprep.subr.mxu0 %v3382_v8  ;;  %2503 = vmatprep.subr.mxu1 %v3760_v58 }
 0x43c   :  { %1510 = vmatpush1.msra.mxu0 %v3386_v2  ;;  %2504 = vmatpush3.msra.mxu1 %v3388_v1 }
 0x43d   :  { %1511 = vmatprep.subr.mxu0 %v3392_v24  ;;  %2505 = vmatprep.subr.mxu1 %v3760_v58 }
 0x43e   :  { %1512 = vmatpush1.msra.mxu0 %v3396_v30  ;;  %2506 = vmatpush3.msra.mxu1 %v3398_v21 }
 0x43f   :  { %1513 = vmatprep.subr.mxu0 %v3402_v60  ;;  %2507 = vmatprep.subr.mxu1 %v3760_v58 }
 0x440   :  { %1514 = vmatpush1.msra.mxu0 %v3406_v36  ;;  %2508 = vmatpush3.msra.mxu1 %v3408_v49 }
 0x441   :  { %1515 = vmatprep.subr.mxu0 %v3412_v50  ;;  %2509 = vmatprep.subr.mxu1 %v3760_v58 }
 0x442   :  { %1516 = vmatpush1.msra.mxu0 %v3416_v51  ;;  %2510 = vmatpush3.msra.mxu1 %v3418_v52 }
 0x443   :  { %1517 = vmatprep.subr.mxu0 %v3286_v5  ;;  %2511 = vmatprep.subr.mxu1 %v3760_v58 }
 0x444   :  { %1518 = vmatpush1.msra.mxu0 %v3288_v6  ;;  %2512 = vmatpush3.msra.mxu1 %v3420_v53 }
 0x445   :  { %1519 = vmatprep.subr.mxu0 %v3290_v7  ;;  %2513 = vmatprep.subr.mxu1 %v3760_v58 }
 0x446   :  { %1520 = vmatpush1.msra.mxu0 %v3293_v9  ;;  %2514 = vmatpush3.msra.mxu1 %v3426_v54 }
 0x447   :  { %1521 = vmatprep.subr.mxu0 %v3296_v10  ;;  %2515 = vmatprep.subr.mxu1 %v3760_v58 }
 0x448   :  { %1522 = vmatpush1.msra.mxu0 %v3299_v11  ;;  %2516 = vmatpush3.msra.mxu1 %v3432_v55 }
 0x449   :  { %1523 = vmatprep.subr.mxu0 %v3302_v12  ;;  %2517 = vmatprep.subr.mxu1 %v3760_v58 }
 0x44a   :  { %1524 = vmatpush1.msra.mxu0 %v3305_v14  ;;  %2518 = vmatpush3.msra.mxu1 %v3438_v56 }
 0x44b   :  { %1525 = vmatprep.subr.mxu0 %v3308_v15  ;;  %2519 = vmatprep.subr.mxu1 %v3760_v58 }
 0x44c   :  { %1526 = vmatpush1.msra.mxu0 %v3311_v16  ;;  %2520 = vmatpush3.msra.mxu1 %v3444_v57 }
 0x44d   :  { %1527 = vmatprep.subr.mxu0 %v3314_v17  ;;  %2521 = vmatprep.subr.mxu1 %v3760_v58 }
 0x44e   :  { %1528 = vmatpush1.msra.mxu0 %v3317_v19  ;;  %2522 = vmatpush3.msra.mxu1 %v3450_v45 }
 0x44f   :  { %1529 = vmatprep.subr.mxu0 %v3320_v20  ;;  %2523 = vmatprep.subr.mxu1 %v3760_v58 }
 0x450   :  { %1530 = vmatpush1.msra.mxu0 %v3323_v29  ;;  %2524 = vmatpush3.msra.mxu1 %v3456_v22 }
 0x451   :  { %1531 = vmatprep.subr.mxu0 %v3326_v35  ;;  %2525 = vmatprep.subr.mxu1 %v3760_v58 }
 0x452   :  { %1532 = vmatpush1.msra.mxu0 %v3779_v46  ;;  %2526 = vmatpush3.msra.mxu1 %v3780_v4 }
 0x453   :  { %1533 = vmatprep.subr.mxu0 %v3781_v61  ;;  %2527 = vmatprep.subr.mxu1 %v3760_v58  ;;  %v3787_v61 = vld [vmem:[#allocation34_spill] sm:$0xff] }
 0x454   :  { %1534 = vmatpush1.msra.mxu0 %v3782_v42  ;;  %1567 = vmatprep.mubr.f32.mxu0 %v3760_v58 }
 0x455   :  { %2528 = vmatpush3.msra.mxu1 %v3783_v41  ;;  %2529 = vmatprep.mubr.msk.f32.mxu1 %vm2787_vm1, %v3760_v58 }
 0x456   :  { %1721 = vmatprep.subr.mxu0 %v3784_v47  ;;  %2532 = vmatprep.subr.mxu1 %v3760_v58 }
 0x4f5   :  { %v1351_v48 = vpop.f32.mrf.mxu0  ;;  %v1422_v39 = vpop.f32.mrf.mxu1 }
 0x4f6   :  { %v1426_v23 = vadd.f32 %v1351_v48, %v3785_v59  ;;  %v1440_v47 = vadd.f32 %v3153_v63, %v1422_v39  ;;  %v3788_v63 = vld [vmem:[#allocation16_spill] sm:$0xff]  ;;  %v3796_v39 = vld [vmem:[#allocation33_spill] sm:$0xff] }
 0x4f7   :  { %v2496_v25 = vpop.f32.mrf.mxu1  ;;  %v1353_v34 = vpop.f32.mrf.mxu0 }
 0x4f8   :  { %v2155_v27 = vmul.f32 -1.442695, %v1426_v23  ;;  %v1433_v38 = vadd.f32 %v1353_v34, %v3786_v37 }
 0x4fa   :  { %2652 = vpow2.f32 %v2155_v27  ;;  %v2156_v26 = vmul.f32 -1.442695, %v1433_v38 }
 0x4fc   :  { %2654 = vpow2.f32 %v2156_v26 }
 0x507   :  { %v2653_v28 = vpop.eup %2652 }
 0x508   :  { %v1430_v31 = vadd.f32 1.0, %v2653_v28 }
 0x509   :  { %v2655_v32 = vpop.eup %2654 }
 0x50a   :  { %2656 = vrcp.f32 %v1430_v31  ;;  %v1437_v46 = vadd.f32 1.0, %v2655_v32 }
 0x517   :  { %v2657_v41 = vpop.eup %2656 }
 0x518   :  { %v1441_v42 = vmul.f32 %v2657_v41, %v1440_v47 }
 0x51a   :  { %v1442_v4 = vadd.f32 %v1441_v42, %v3787_v61  ;;  %v3637_v61 = vld [vmem:[%s3713_s4] ss:$0 sm:$0xff]  ;;  %s2788_s4 = smov [#allocation9]  }
 0x51b   :  { %s2110_s14 = sshll.u32 %s2788_s4, 4  ;;  %s2111_s14 = int_to_ptr.vmem [resolvable:$true] %s2110_s14 }
 0x51c   :  { %2658 = vtanh.f32 %v1442_v4  ;;  %s2753_s15 = scalar_lea.vmem %s2111_s14, 1024  ;;  %p2758_p2 = scmp.lt.s32.totalorder %s2111_s14, %s2111_s14 }
 0x51d   :  { %2660 = vrcp.f32 %v1437_v46  ;;  %p2754_p1 = scmp.ne.s32.totalorder %s2111_s14, %s2753_s15  ;;  %p2759_p3 = scmp.lt.s32.totalorder %s2753_s15, %s2753_s15 }
 0x51f   :  { %p2760_p4 = por %p2759_p3, %p2758_p2 }
 0x521   :  { %p2761_p5 = pnand %p2760_p4, %p2754_p1 }
 0x529   :  { %v2659_v48 = vpop.eup %2658 }
 0x52a   :  { %v1444_v59 = vsub.f32 %v3483_v33, %v2659_v48  ;;  %v2661_v23 = vpop.eup %2660 }
 0x52c   :  { %v1445_v25 = vmul.f32 %v2661_v23, %v1444_v59 }
 0x52e   :  { %v3560_v27 = vadd.f32 %v2659_v48, %v1445_v25 }
 0x530   :  { %1450 = vst [vmem:[#allocation9 + $0x20] sm:$0xff] %v3560_v27  ;;  %1568 = vmatmul.mubr.f32.vlgmr.msra.gmra.mxu0 %v3560_v27  ;;  %2530 = vmatmul.mubr.f32.vlgmr.msra.gmra.mxu1 %v3560_v27 }
 0x531   :  { %1722 = vmatpush1.msra.mxu0 %v3356_v40  ;;  %2533 = vmatpush3.msra.mxu1 %v3358_v43 }
 0x532   :  { %1723 = vmatprep.subr.mxu0 %v3362_v44  ;;  %2534 = vmatprep.subr.mxu1 %v3760_v58 }
 0x533   :  { %1724 = vmatpush1.msra.mxu0 %v3366_v62  ;;  %2535 = vmatpush3.msra.mxu1 %v3368_v13 }
 0x534   :  { %1725 = vmatprep.subr.mxu0 %v3372_v0  ;;  %2536 = vmatprep.subr.mxu1 %v3760_v58 }
 0x535   :  { %1726 = vmatpush1.msra.mxu0 %v3376_v3  ;;  %2537 = vmatpush3.msra.mxu1 %v3378_v18 }
 0x536   :  { %1727 = vmatprep.subr.mxu0 %v3382_v8  ;;  %2538 = vmatprep.subr.mxu1 %v3760_v58 }
 0x537   :  { %1728 = vmatpush1.msra.mxu0 %v3386_v2  ;;  %2539 = vmatpush3.msra.mxu1 %v3388_v1 }
 0x538   :  { %1729 = vmatprep.subr.mxu0 %v3392_v24  ;;  %2540 = vmatprep.subr.mxu1 %v3760_v58 }
 0x539   :  { %1730 = vmatpush1.msra.mxu0 %v3396_v30  ;;  %2541 = vmatpush3.msra.mxu1 %v3398_v21 }
 0x53a   :  { %1731 = vmatprep.subr.mxu0 %v3402_v60  ;;  %2542 = vmatprep.subr.mxu1 %v3760_v58 }
 0x53b   :  { %1732 = vmatpush1.msra.mxu0 %v3406_v36  ;;  %2543 = vmatpush3.msra.mxu1 %v3408_v49 }
 0x53c   :  { %1733 = vmatprep.subr.mxu0 %v3412_v50  ;;  %2544 = vmatprep.subr.mxu1 %v3760_v58 }
 0x53d   :  { %1734 = vmatpush1.msra.mxu0 %v3416_v51  ;;  %2545 = vmatpush3.msra.mxu1 %v3418_v52 }
 0x53e   :  { %1735 = vmatprep.subr.mxu0 %v3286_v5  ;;  %2546 = vmatprep.subr.mxu1 %v3760_v58  ;;  %v3789_v5 = vld [vmem:[#allocation13_spill] sm:$0xff] }
 0x53f   :  { %1736 = vmatpush1.msra.mxu0 %v3288_v6  ;;  %2547 = vmatpush3.msra.mxu1 %v3420_v53  ;;  %v3790_v6 = vld [vmem:[#allocation14_spill] sm:$0xff] }
 0x540   :  { %1737 = vmatprep.subr.mxu0 %v3290_v7  ;;  %2548 = vmatprep.subr.mxu1 %v3760_v58  ;;  %v3791_v7 = vld [vmem:[#allocation15_spill] sm:$0xff] }
 0x541   :  { %1738 = vmatpush1.msra.mxu0 %v3293_v9  ;;  %2549 = vmatpush3.msra.mxu1 %v3426_v54  ;;  %v3792_v9 = vld [vmem:[#allocation18_spill] sm:$0xff] }
 0x542   :  { %1739 = vmatprep.subr.mxu0 %v3296_v10  ;;  %2550 = vmatprep.subr.mxu1 %v3760_v58  ;;  %v3793_v10 = vld [vmem:[#allocation17_spill] sm:$0xff] }
 0x543   :  { %1740 = vmatpush1.msra.mxu0 %v3299_v11  ;;  %2551 = vmatpush3.msra.mxu1 %v3432_v55 }
 0x544   :  { %1741 = vmatprep.subr.mxu0 %v3302_v12  ;;  %2552 = vmatprep.subr.mxu1 %v3760_v58 }
 0x545   :  { %1742 = vmatpush1.msra.mxu0 %v3305_v14  ;;  %2553 = vmatpush3.msra.mxu1 %v3438_v56  ;;  %v3794_v14 = vld [vmem:[#allocation27_spill] sm:$0xff] }
 0x546   :  { %1743 = vmatprep.subr.mxu0 %v3308_v15  ;;  %2554 = vmatprep.subr.mxu1 %v3760_v58 }
 0x547   :  { %1744 = vmatpush1.msra.mxu0 %v3311_v16  ;;  %2555 = vmatpush3.msra.mxu1 %v3444_v57 }
 0x548   :  { %1745 = vmatprep.subr.mxu0 %v3314_v17  ;;  %2556 = vmatprep.subr.mxu1 %v3760_v58 }
 0x549   :  { %1746 = vmatpush1.msra.mxu0 %v3317_v19  ;;  %2557 = vmatpush3.msra.mxu1 %v3450_v45 }
 0x54a   :  { %1747 = vmatprep.subr.mxu0 %v3320_v20  ;;  %2558 = vmatprep.subr.mxu1 %v3760_v58  ;;  %v3795_v20 = vld [vmem:[#allocation28_spill] sm:$0xff] }
 0x54b   :  { %1748 = vmatpush1.msra.mxu0 %v3323_v29  ;;  %2559 = vmatpush3.msra.mxu1 %v3456_v22 }
 0x54c   :  { %1749 = vmatprep.subr.mxu0 %v3326_v35  ;;  %2560 = vmatprep.subr.mxu1 %v3760_v58 }
 0x54d   :  { %1750 = vmatpush1.msra.mxu0 %v3788_v63  ;;  %2561 = vmatpush3.msra.mxu1 %v3789_v5 }
 0x54e   :  { %1751 = vmatprep.subr.mxu0 %v3790_v6  ;;  %2562 = vmatprep.subr.mxu1 %v3760_v58 }
 0x54f   :  { %1752 = vmatpush1.msra.mxu0 %v3791_v7  ;;  %1785 = vmatprep.mubr.f32.mxu0 %v3760_v58 }
 0x550   :  { %2563 = vmatpush3.msra.mxu1 %v3792_v9  ;;  %2564 = vmatprep.mubr.msk.f32.mxu1 %vm2787_vm1, %v3760_v58 }
 0x551   :  { %1939 = vmatprep.subr.mxu0 %v3793_v10  ;;  %2567 = vmatprep.subr.mxu1 %v3760_v58 }
 0x5f0   :  { %v1569_v11 = vpop.f32.mrf.mxu0  ;;  %v1640_v12 = vpop.f32.mrf.mxu1 }
 0x5f1   :  { %v1644_v15 = vadd.f32 %v1569_v11, %v3794_v14  ;;  %v1658_v42 = vadd.f32 %v3637_v61, %v1640_v12 }
 0x5f2   :  { %v2531_v16 = vpop.f32.mrf.mxu1  ;;  %v1571_v19 = vpop.f32.mrf.mxu0 }
 0x5f3   :  { %v2157_v17 = vmul.f32 -1.442695, %v1644_v15  ;;  %v1651_v29 = vadd.f32 %v1571_v19, %v3795_v20 }
 0x5f5   :  { %2662 = vpow2.f32 %v2157_v17  ;;  %v2158_v35 = vmul.f32 -1.442695, %v1651_v29  ;;  %v3800_v17 = vld [vmem:[#allocation31_spill] sm:$0xff] }
 0x5f7   :  { %2664 = vpow2.f32 %v2158_v35 }
 0x602   :  { %v2663_v33 = vpop.eup %2662 }
 0x603   :  { %v1648_v46 = vadd.f32 1.0, %v2663_v33  ;;  %v3801_v33 = vld [vmem:[#allocation32_spill] sm:$0xff] }
 0x604   :  { %v2665_v4 = vpop.eup %2664 }
 0x605   :  { %2666 = vrcp.f32 %v1648_v46  ;;  %v1655_v37 = vadd.f32 1.0, %v2665_v4 }
 0x612   :  { %v2667_v41 = vpop.eup %2666 }
 0x613   :  { %v1659_v47 = vmul.f32 %v2667_v41, %v1658_v42 }
 0x615   :  { %v1660_v34 = vadd.f32 %v1659_v47, %v3796_v39 }
 0x617   :  { %2668 = vtanh.f32 %v1660_v34 }
 0x618   :  { %2670 = vrcp.f32 %v1655_v37 }
 0x624   :  { %v2669_v38 = vpop.eup %2668 }
 0x625   :  { %v1662_v26 = vsub.f32 %v3560_v27, %v2669_v38  ;;  %v2671_v28 = vpop.eup %2670 }
 0x627   :  { %v1663_v31 = vmul.f32 %v2671_v28, %v1662_v26 }
 0x629   :  { %v3642_v32 = vadd.f32 %v2669_v38, %v1663_v31  ;;  %v3802_v38 = vld [vmem:[#allocation35_spill] sm:$0xff] }
 0x62b   :  { %1668 = vst [vmem:[#allocation9 + $0x28] sm:$0xff] %v3642_v32  ;;  %1786 = vmatmul.mubr.f32.vlgmr.msra.gmra.mxu0 %v3642_v32  ;;  %2565 = vmatmul.mubr.f32.vlgmr.msra.gmra.mxu1 %v3642_v32 }
 0x62c   :  { %1940 = vmatpush1.msra.mxu0 %v3356_v40  ;;  %2568 = vmatpush3.msra.mxu1 %v3358_v43  ;;  %v1916_v40 = vld [vmem:[#allocation8 + $0xc8] sm:$0xff]  ;;  %v1915_v43 = vld [vmem:[#allocation8 + $0xc0] sm:$0xff] }
 0x62d   :  { %1941 = vmatprep.subr.mxu0 %v3362_v44  ;;  %2569 = vmatprep.subr.mxu1 %v3760_v58  ;;  %v1913_v44 = vld [vmem:[#allocation8 + $0xb0] sm:$0xff] }
 0x62e   :  { %1942 = vmatpush1.msra.mxu0 %v3366_v62  ;;  %2570 = vmatpush3.msra.mxu1 %v3368_v13  ;;  %v1912_v62 = vld [vmem:[#allocation8 + $0xa8] sm:$0xff]  ;;  %v1910_v13 = vld [vmem:[#allocation8 + $0x98] sm:$0xff] }
 0x62f   :  { %1943 = vmatprep.subr.mxu0 %v3372_v0  ;;  %2571 = vmatprep.subr.mxu1 %v3760_v58  ;;  %v1909_v0 = vld [vmem:[#allocation8 + $0x90] sm:$0xff] }
 0x630   :  { %1944 = vmatpush1.msra.mxu0 %v3376_v3  ;;  %2572 = vmatpush3.msra.mxu1 %v3378_v18  ;;  %v1907_v3 = vld [vmem:[#allocation8 + $0x80] sm:$0xff]  ;;  %v1906_v18 = vld [vmem:[#allocation8 + $0x78] sm:$0xff] }
 0x631   :  { %1945 = vmatprep.subr.mxu0 %v3382_v8  ;;  %2573 = vmatprep.subr.mxu1 %v3760_v58  ;;  %v1904_v8 = vld [vmem:[#allocation8 + $0x68] sm:$0xff] }
 0x632   :  { %1946 = vmatpush1.msra.mxu0 %v3386_v2  ;;  %2574 = vmatpush3.msra.mxu1 %v3388_v1  ;;  %v1903_v2 = vld [vmem:[#allocation8 + $0x60] sm:$0xff]  ;;  %v1900_v1 = vld [vmem:[#allocation8 + $0x48] sm:$0xff] }
 0x633   :  { %1947 = vmatprep.subr.mxu0 %v3392_v24  ;;  %2575 = vmatprep.subr.mxu1 %v3760_v58  ;;  %v1898_v24 = vld [vmem:[#allocation8 + $0x38] sm:$0xff] }
 0x634   :  { %1948 = vmatpush1.msra.mxu0 %v3396_v30  ;;  %2576 = vmatpush3.msra.mxu1 %v3398_v21  ;;  %v1897_v30 = vld [vmem:[#allocation8 + $0x30] sm:$0xff]  ;;  %v1895_v21 = vld [vmem:[#allocation8 + $0x20] sm:$0xff] }
 0x635   :  { %1949 = vmatprep.subr.mxu0 %v3402_v60  ;;  %2577 = vmatprep.subr.mxu1 %v3760_v58  ;;  %v1894_v60 = vld [vmem:[#allocation8 + $0x18] sm:$0xff] }
 0x636   :  { %1950 = vmatpush1.msra.mxu0 %v3406_v36  ;;  %2578 = vmatpush3.msra.mxu1 %v3408_v49  ;;  %v1892_v36 = vld [vmem:[#allocation8 + $0x8] sm:$0xff]  ;;  %v1891_v49 = vld [vmem:[#allocation8] sm:$0xff] }
 0x637   :  { %1951 = vmatprep.subr.mxu0 %v3412_v50  ;;  %2579 = vmatprep.subr.mxu1 %v3760_v58 }
 0x638   :  { %1952 = vmatpush1.msra.mxu0 %v3416_v51  ;;  %2580 = vmatpush3.msra.mxu1 %v3418_v52  ;;  %v3797_v52 = vld [vmem:[#allocation29_spill] sm:$0xff] }
 0x639   :  { %2581 = vmatprep.subr.mxu1 %v3760_v58  ;;  %2003 = vmatprep.mubr.f32.mxu0 %v3760_v58 }
 0x63a   :  { %2582 = vmatpush3.msra.mxu1 %v3420_v53  ;;  %2599 = vmatprep.mubr.msk.f32.mxu1 %vm2787_vm1, %v3760_v58 }
 0x63b   :  { %2583 = vmatprep.subr.mxu1 %v3760_v58  ;;  %1953 = vmatprep.subr.mxu0 %v1916_v40 }
 0x63c   :  { %2584 = vmatpush3.msra.mxu1 %v3426_v54  ;;  %1954 = vmatpush1.msra.mxu0 %v1915_v43 }
 0x63d   :  { %2585 = vmatprep.subr.mxu1 %v3760_v58  ;;  %1955 = vmatprep.subr.mxu0 %v1913_v44 }
 0x63e   :  { %2586 = vmatpush3.msra.mxu1 %v3432_v55  ;;  %1956 = vmatpush1.msra.mxu0 %v1912_v62 }
 0x63f   :  { %2587 = vmatprep.subr.mxu1 %v3760_v58  ;;  %1957 = vmatprep.subr.mxu0 %v1910_v13 }
 0x640   :  { %2588 = vmatpush3.msra.mxu1 %v3438_v56  ;;  %1958 = vmatpush1.msra.mxu0 %v1909_v0 }
 0x641   :  { %2589 = vmatprep.subr.mxu1 %v3760_v58  ;;  %1959 = vmatprep.subr.mxu0 %v1907_v3 }
 0x642   :  { %2590 = vmatpush3.msra.mxu1 %v3444_v57  ;;  %1960 = vmatpush1.msra.mxu0 %v1906_v18  ;;  %v3798_v57 = vld [vmem:[#allocation30_spill] sm:$0xff] }
 0x643   :  { %2591 = vmatprep.subr.mxu1 %v3760_v58  ;;  %1961 = vmatprep.subr.mxu0 %v1904_v8 }
 0x644   :  { %2592 = vmatpush3.msra.mxu1 %v3450_v45  ;;  %1962 = vmatpush1.msra.mxu0 %v1903_v2 }
 0x645   :  { %2593 = vmatprep.subr.mxu1 %v3760_v58 }
 0x646   :  { %2594 = vmatpush3.msra.mxu1 %v3456_v22 }
 0x647   :  { %2595 = vmatprep.subr.mxu1 %v3760_v58 }
 0x648   :  { %2596 = vmatpush3.msra.mxu1 %v3789_v5  ;;  %v3799_v5 = vld [vmem:[#allocation36_spill] sm:$0xff] }
 0x649   :  { %2597 = vmatprep.subr.mxu1 %v3760_v58  ;;  %v1901_v58 = vld [vmem:[#allocation8 + $0x50] sm:$0xff] }
 0x64a   :  { %2598 = vmatpush3.msra.mxu1 %v3792_v9  ;;  %1963 = vmatprep.subr.mxu0 %v1901_v58 }
 0x64b   :  { %1964 = vmatpush1.msra.mxu0 %v1900_v1 }
 0x64c   :  { %1965 = vmatprep.subr.mxu0 %v1898_v24 }
 0x64d   :  { %1966 = vmatpush1.msra.mxu0 %v1897_v30 }
 0x64e   :  { %1967 = vmatprep.subr.mxu0 %v1895_v21 }
 0x64f   :  { %1968 = vmatpush1.msra.mxu0 %v1894_v60 }
 0x650   :  { %1969 = vmatprep.subr.mxu0 %v1892_v36 }
 0x651   :  { %1970 = vmatpush1.msra.mxu0 %v1891_v49 }
 0x6eb   :  { %v1787_v50 = vpop.f32.mrf.mxu0  ;;  %v1858_v51 = vpop.f32.mrf.mxu1 }
 0x6ec   :  { %v1862_v53 = vadd.f32 %v1787_v50, %v3797_v52  ;;  %v1876_v25 = vadd.f32 %v3637_v61, %v1858_v51 }
 0x6ed   :  { %v2566_v54 = vpop.f32.mrf.mxu1  ;;  %v1789_v56 = vpop.f32.mrf.mxu0 }
 0x6ee   :  { %v2159_v55 = vmul.f32 -1.442695, %v1862_v53  ;;  %v1869_v45 = vadd.f32 %v1789_v56, %v3798_v57 }
 0x6f0   :  { %2672 = vpow2.f32 %v2159_v55  ;;  %v2160_v22 = vmul.f32 -1.442695, %v1869_v45 }
 0x6f2   :  { %2674 = vpow2.f32 %v2160_v22 }
 0x6fd   :  { %v2673_v48 = vpop.eup %2672 }
 0x6fe   :  { %v1866_v59 = vadd.f32 1.0, %v2673_v48 }
 0x6ff   :  { %v2675_v23 = vpop.eup %2674 }
 0x700   :  { %2676 = vrcp.f32 %v1866_v59  ;;  %v1873_v7 = vadd.f32 1.0, %v2675_v23 }
 0x70d   :  { %v2677_v27 = vpop.eup %2676 }
 0x70e   :  { %v1877_v63 = vmul.f32 %v2677_v27, %v1876_v25 }
 0x710   :  { %v1878_v6 = vadd.f32 %v1877_v63, %v3799_v5 }
 0x712   :  { %2678 = vtanh.f32 %v1878_v6 }
 0x713   :  { %2680 = vrcp.f32 %v1873_v7 }
 0x71f   :  { %v2679_v9 = vpop.eup %2678 }
 0x720   :  { %v1880_v10 = vsub.f32 %v3642_v32, %v2679_v9  ;;  %v2681_v11 = vpop.eup %2680 }
 0x722   :  { %v1881_v12 = vmul.f32 %v2681_v11, %v1880_v10 }
 0x724   :  { %v1882_v14 = vadd.f32 %v2679_v9, %v1881_v12 }
 0x726   :  { %1886 = vst [vmem:[#allocation9 + $0x30] sm:$0xff] %v1882_v14  ;;  %2004 = vmatmul.mubr.f32.vlgmr.msra.gmra.mxu0 %v1882_v14  ;;  %2600 = vmatmul.mubr.f32.vlgmr.msra.gmra.mxu1 %v1882_v14 }
 0x7e6   :  { %v2005_v15 = vpop.f32.mrf.mxu0  ;;  %v2076_v16 = vpop.f32.mrf.mxu1 }
 0x7e7   :  { %v2080_v19 = vadd.f32 %v2005_v15, %v3800_v17  ;;  %v2094_v39 = vadd.f32 %v3637_v61, %v2076_v16 }
 0x7e8   :  { %v2601_v20 = vpop.f32.mrf.mxu1  ;;  %v2007_v35 = vpop.f32.mrf.mxu0 }
 0x7e9   :  { %v2161_v29 = vmul.f32 -1.442695, %v2080_v19  ;;  %v2087_v46 = vadd.f32 %v2007_v35, %v3801_v33 }
 0x7eb   :  { %2682 = vpow2.f32 %v2161_v29  ;;  %v2162_v4 = vmul.f32 -1.442695, %v2087_v46 }
 0x7ed   :  { %2684 = vpow2.f32 %v2162_v4 }
 0x7f8   :  { %v2683_v42 = vpop.eup %2682 }
 0x7f9   :  { %v2084_v41 = vadd.f32 1.0, %v2683_v42 }
 0x7fa   :  { %v2685_v47 = vpop.eup %2684 }
 0x7fb   :  { %2686 = vrcp.f32 %v2084_v41  ;;  %v2091_v28 = vadd.f32 1.0, %v2685_v47 }
 0x808   :  { %v2687_v34 = vpop.eup %2686 }
 0x809   :  { %v2095_v37 = vmul.f32 %v2687_v34, %v2094_v39 }
 0x80b   :  { %v2096_v26 = vadd.f32 %v2095_v37, %v3802_v38 }
 0x80d   :  { %2688 = vtanh.f32 %v2096_v26 }
 0x80e   :  { %2690 = vrcp.f32 %v2091_v28 }
 0x81a   :  { %v2689_v31 = vpop.eup %2688 }
 0x81b   :  { %v2098_v32 = vsub.f32 %v1882_v14, %v2689_v31  ;;  %v2691_v40 = vpop.eup %2690 }
 0x81d   :  { %v2099_v43 = vmul.f32 %v2691_v40, %v2098_v32 }
 0x81f   :  { %v2100_v44 = vadd.f32 %v2689_v31, %v2099_v43 }
 0x821   :  { %2104 = vst [vmem:[#allocation9 + $0x38] sm:$0xff] %v2100_v44 }
 0x822   :  { %2764 = shalt.err (!%p2761_p5)
}
 0x823   :  { %2116 = dma.vmem_to_hbm [thread:$0]  %s2111_s14, 1024, %s3714_s5, [#allocation5], %s2781_s26, %s2781_s26, %s2782_s27  }
 0x824   :  { %2777 = dma.done.wait [#allocation5], 1024  }
 0x825   :  { %2778 = vsyncadd [#allocation5], 4294966272 }
 0x826   :  { %2120 = vsyncpa [#allocation4], 1 }
 0x827   :  { %2121 = vsyncpa [#allocation7], 1 }
 0x828   :  { %2122 = vsyncpa [#allocation5], 1 }

</bundles_post_ra>
